<compile_context>
chip_gen: v7x
topology: tpu7x:2x2x1
jax: 0.10.0
libtpu: 0.0.40
codegen_flags: <defaults>
</compile_context>

<pallas_src>
import functools

import jax
import jax.numpy as jnp
from jax.experimental import pallas as pl
from jax.experimental.pallas import tpu as pltpu

# VGG-lite / MINE hyper-parameters (static).
CIN, C1, C2, IMG, HID = 4, 8, 16, 16, 64
DX = CIN * IMG * IMG            # 1024  flattened input
D1 = C1 * (IMG // 2) ** 2       # 512   flattened block-1 cache
D2 = C2 * (IMG // 4) ** 2       # 256   flattened block-2 cache


# ----------------------------- Pallas kernels -----------------------------

def _vgg_kernel(x_ref, wb1, cb1, h1e, h1o, wsel1, wb2, cb2, h2e, h2o, wsel2,
                o1_ref, o2_ref, xp1, xp2, *, NB):
    """Both conv blocks (conv3x3 + bias + ReLU + 2x2 maxpool), NB images/step."""
    bf, f32 = jnp.bfloat16, jnp.float32
    H1, K1, WC1 = IMG, (IMG + 2) * CIN, IMG * C1                   # 16, 72, 128
    H2, K2, WC2 = IMG // 2, (IMG // 2 + 2) * C1, (IMG // 2) * C2   # 8, 80, 128

    # Zero the padded-input scratch every step (cheap; stays correct when the
    # "parallel" grid is sharded across TensorCores).
    xp1[...] = jnp.zeros_like(xp1)
    xp2[...] = jnp.zeros_like(xp2)

    def conv_block(xp, H, K, WC, C, wb, cb, he, ho, wsel):
        # 3 row-banded matmuls == 3x3 conv, padding=1 (no per-tap slicing/im2col).
        acc = jnp.zeros((NB * H, WC), f32)
        for kh in range(3):
            lhs = xp[:, kh:kh + H, :].reshape(NB * H, K)           # bf16
            acc = acc + jnp.dot(lhs, wb[kh], preferred_element_type=f32)
        actb = jnp.maximum(acc + cb[...], 0.0).astype(bf)          # bias + ReLU
        # 2x2 max pool: even/odd row-selection matmuls, then lane-roll for the
        # column pairs + 0/1 column-selection matmul (wrap-around columns are
        # never selected because W is even).
        hp = jnp.maximum(jnp.dot(he[...], actb, preferred_element_type=f32),
                         jnp.dot(ho[...], actb, preferred_element_type=f32))
        hp = jnp.maximum(hp, pltpu.roll(hp, shift=WC - C, axis=1)).astype(bf)
        return jnp.dot(hp, wsel[...], preferred_element_type=f32).astype(bf)

    # ---- block 1 ----
    xp1[:, 1:1 + H1, CIN:CIN + IMG * CIN] = x_ref[...]
    p1 = conv_block(xp1, H1, K1, WC1, C1, wb1, cb1, h1e, h1o, wsel1)  # (NB*8, 64)
    o1_ref[...] = p1

    # ---- block 2 (consumes block-1 output straight from VMEM, no HBM trip) ----
    xp2[:, 1:1 + H2, C1:C1 + (IMG // 2) * C1] = p1.reshape(NB, H1 // 2, (IMG // 2) * C1)
    p2 = conv_block(xp2, H2, K2, WC2, C2, wb2, cb2, h2e, h2o, wsel2)  # (NB*4, 64)
    o2_ref[...] = p2


def _mine_kernel(x_ref, o1_ref, o1s_ref, o2_ref, o2s_ref,
                 w1x, w1o1, w1o2, b1, w2, b2, w3, b3, y_ref):
    """Both layers' MINE T nets, both (t, t_shuffled) variants, fused."""
    bf, f32 = jnp.bfloat16, jnp.float32
    nb = x_ref.shape[0]

    # x-side projection of BOTH layers (lane-concatenated weights): computed once,
    # shared by all four evaluations.
    u = jnp.dot(x_ref[...], w1x[...], preferred_element_type=f32)            # (NB, 128)
    # o-side projections land in disjoint halves of the 128-wide hidden
    # (zero-padded weights), fusing the two statistics nets into one.
    v = (jnp.dot(o1_ref[...], w1o1[...], preferred_element_type=f32)
         + jnp.dot(o2_ref[...], w1o2[...], preferred_element_type=f32))
    vs = (jnp.dot(o1s_ref[...], w1o1[...], preferred_element_type=f32)
          + jnp.dot(o2s_ref[...], w1o2[...], preferred_element_type=f32))

    # Stack (original, shuffled) along M so the tail runs once at 2x row count.
    # TODO(synk): reference mine.py statistics nets may use ELU; ReLU used here.
    h0 = jnp.concatenate([u + v, u + vs], axis=0)                            # (2NB, 128)
    h1 = jnp.maximum(h0 + b1[...], 0.0).astype(bf)
    h2 = jnp.maximum(jnp.dot(h1, w2[...], preferred_element_type=f32) + b2[...],
                     0.0).astype(bf)                                         # block-diag W2
    y = jnp.dot(h2, w3[...], preferred_element_type=f32) + b3[...]           # (2NB, 2)

    y_ref[:, 0:2] = y[:nb, :]     # [t_block1, t_block2]
    y_ref[:, 2:4] = y[nb:, :]     # [ts_block1, ts_block2]


# --------------------------- pallas_call wrappers --------------------------

def _const_spec(a):
    return pl.BlockSpec(a.shape, lambda *_: (0,) * a.ndim)


def _pool_selectors(NB):
    """Even/odd row selectors (batched layout) + column selectors, bf16."""
    def row_sel(H):
        r = jnp.arange(NB * (H // 2))
        n, h = r // (H // 2), r % (H // 2)
        src = (n * H + 2 * h)[:, None]
        c = jnp.arange(NB * H)[None, :]
        return ((c == src).astype(jnp.bfloat16), (c == src + 1).astype(jnp.bfloat16))

    def col_sel(W, C):
        q = jnp.arange((W // 2) * C)
        rows = 2 * (q // C) * C + (q % C)
        sel = jnp.zeros((W * C, (W // 2) * C), jnp.float32).at[rows, q].set(1.0)
        return sel.astype(jnp.bfloat16)

    h1e, h1o = row_sel(IMG)
    h2e, h2o = row_sel(IMG // 2)
    return h1e, h1o, col_sel(IMG, C1), h2e, h2o, col_sel(IMG // 2, C2)


def vgg_backbone(x_slab, prep, *, NB):
    N = x_slab.shape[0]
    h1e, h1o, wsel1, h2e, h2o, wsel2 = _pool_selectors(NB)
    return pl.pallas_call(
        functools.partial(_vgg_kernel, NB=NB),
        out_shape=(jax.ShapeDtypeStruct((N * (IMG // 2), (IMG // 2) * C1), jnp.bfloat16),
                   jax.ShapeDtypeStruct((N * (IMG // 4), (IMG // 4) * C2), jnp.bfloat16)),
        grid=(N // NB,),
        in_specs=[
            pl.BlockSpec((NB, IMG, IMG * CIN), lambda b: (b, 0, 0)),
            _const_spec(prep["wb1"]), _const_spec(prep["cb1"]),
            _const_spec(h1e), _const_spec(h1o), _const_spec(wsel1),
            _const_spec(prep["wb2"]), _const_spec(prep["cb2"]),
            _const_spec(h2e), _const_spec(h2o), _const_spec(wsel2),
        ],
        out_specs=(pl.BlockSpec((NB * (IMG // 2), (IMG // 2) * C1), lambda b: (b, 0)),
                   pl.BlockSpec((NB * (IMG // 4), (IMG // 4) * C2), lambda b: (b, 0))),
        scratch_shapes=[pltpu.VMEM((NB, IMG + 2, (IMG + 2) * CIN), jnp.bfloat16),
                        pltpu.VMEM((NB, IMG // 2 + 2, (IMG // 2 + 2) * C1), jnp.bfloat16)],
        compiler_params=pltpu.CompilerParams(dimension_semantics=("parallel",)),
    )(x_slab, prep["wb1"], prep["cb1"], h1e, h1o, wsel1,
      prep["wb2"], prep["cb2"], h2e, h2o, wsel2)


def mine_tnets(x_flat, o1, o1s, o2, o2s, mine_w, *, NBm):
    N = x_flat.shape[0]
    w1x, w1o1, w1o2, b1, w2, b2, w3, b3 = mine_w

    def rows(d):
        return pl.BlockSpec((NBm, d), lambda m: (m, 0))

    return pl.pallas_call(
        _mine_kernel,
        out_shape=jax.ShapeDtypeStruct((N, 4), jnp.float32),
        grid=(N // NBm,),
        in_specs=[rows(DX), rows(D1), rows(D1), rows(D2), rows(D2),
                  _const_spec(w1x), _const_spec(w1o1), _const_spec(w1o2), _const_spec(b1),
                  _const_spec(w2), _const_spec(b2), _const_spec(w3), _const_spec(b3)],
        out_specs=pl.BlockSpec((NBm, 4), lambda m: (m, 0)),
        compiler_params=pltpu.CompilerParams(dimension_semantics=("parallel",)),
    )(x_flat, o1, o1s, o2, o2s, w1x, w1o1, w1o2, b1, w2, b2, w3, b3)


# ------------------------------- model glue --------------------------------

def mime_vgg_forward(prep, x_nchw, key):
    N = x_nchw.shape[0]
    assert N % 2 == 0, "batch assumed even (2x2 pooling + 8-sublane output tiling)"
    NB = next(c for c in (16, 8, 4, 2) if N % c == 0)                 # conv batch block
    NBm = next((c for c in (512, 256, 128, 64, 32, 16, 8) if N % c == 0), N)

    # Single XLA prep op: NCHW -> lane-dense (N, H, W*C) bf16 slab.  Conv padding
    # happens inside the kernel; the same slab is reused (for free) as the MINE
    # x input because W1x rows were permuted CHW->HWC at prep time.
    x_slab = jnp.transpose(x_nchw, (0, 2, 3, 1)).reshape(N, IMG, IMG * CIN).astype(jnp.bfloat16)

    o1, o2 = vgg_backbone(x_slab, prep, NB=NB)                        # pooled caches, bf16
    o1f = jax.lax.stop_gradient(o1).reshape(N, D1)                    # .detach(); free HBM reshape
    o2f = jax.lax.stop_gradient(o2).reshape(N, D2)
    x_flat = x_slab.reshape(N, DX)                                    # free HBM reshape

    # torch.randperm per layer.
    # TODO(synk): the shuffled-cache gather stays in XLA; for large N it could be
    # fused into the MINE kernel via PrefetchScalarGridSpec.
    perm1 = jax.random.permutation(jax.random.fold_in(key, 0), N)
    perm2 = jax.random.permutation(jax.random.fold_in(key, 1), N)

    y = mine_tnets(x_flat, o1f, o1f[perm1], o2f, o2f[perm2], prep["mine"], NBm=NBm)
    t = {"block1": y[:, 0:1], "block2": y[:, 1:2]}
    t_shuffled = {"block1": y[:, 2:3], "block2": y[:, 3:4]}
    return t, t_shuffled


# --------------------- deterministic init + weight packing -----------------

def _init(key, shape):
    fan_in = shape[0] if len(shape) == 2 else shape[0] * shape[1] * shape[2]
    return jax.random.normal(key, shape, jnp.float32) * (1.0 / jnp.sqrt(float(fan_in)))


def init_params(key):
    ks = jax.random.split(key, 4)
    params = {
        "conv1_w": _init(ks[0], (3, 3, CIN, C1)), "conv1_b": jnp.zeros((C1,), jnp.float32),
        "conv2_w": _init(ks[1], (3, 3, C1, C2)), "conv2_b": jnp.zeros((C2,), jnp.float32),
        # NOTE: the VGG linear head (pred) is never returned by forward(), so it
        # is not instantiated / computed.
    }

    def mine_params(k, d_in):
        ka, kb, kc = jax.random.split(k, 3)
        return (_init(ka, (d_in, HID)), jnp.zeros((HID,), jnp.float32),
                _init(kb, (HID, HID)), jnp.zeros((HID,), jnp.float32),
                _init(kc, (HID, 1)), jnp.zeros((1,), jnp.float32))

    cfg_params = {"block1": mine_params(ks[2], DX + D1),
                  "block2": mine_params(ks[3], DX + D2)}
    return params, cfg_params


def _banded_taps(wk, W):
    # (3,3,Cin,Cout) -> (3, (W+2)*Cin, W*Cout): per-kernel-row banded weights so a
    # 3x3 conv is 3 matmuls against full padded rows (no per-tap slicing/im2col).
    Cin, Cout = wk.shape[2], wk.shape[3]
    v = jnp.arange(W + 2)[None, :, None]
    w = jnp.arange(W)[None, None, :]
    k = jnp.arange(3)[:, None, None]
    sel = (v == w + k).astype(wk.dtype)                       # (3, W+2, W)
    band = jnp.einsum('kvw,hkio->hviwo', sel, wk)             # (3, W+2, Cin, W, Cout)
    return band.reshape(3, (W + 2) * Cin, W * Cout).astype(jnp.bfloat16)


def _chw_to_hwc_rows(w, C, H, W):
    # Weight rows are defined in torch CHW-flatten order; reorder them so the
    # kernels consume HWC (lane-packed) features with identical math.
    idx = jnp.arange(C * H * W).reshape(C, H, W).transpose(1, 2, 0).reshape(-1)
    return w[idx]


def prepare_params(params, cfg_params):
    bf = jnp.bfloat16
    w1_1, b1_1, w2_1, b2_1, w3_1, b3_1 = cfg_params["block1"]
    w1_2, b1_2, w2_2, b2_2, w3_2, b3_2 = cfg_params["block2"]
    zh = jnp.zeros((HID, HID), jnp.float32)
    z1 = jnp.zeros((HID, 1), jnp.float32)

    mine = (
        # x-side projections of both layers fused into one (DX, 2*HID) matrix
        jnp.concatenate([_chw_to_hwc_rows(w1_1[:DX], CIN, IMG, IMG),
                         _chw_to_hwc_rows(w1_2[:DX], CIN, IMG, IMG)], axis=1).astype(bf),
        # o-side projections, zero-padded into the shared 128-wide hidden
        jnp.concatenate([_chw_to_hwc_rows(w1_1[DX:], C1, IMG // 2, IMG // 2),
                         jnp.zeros((D1, HID), jnp.float32)], axis=1).astype(bf),
        jnp.concatenate([jnp.zeros((D2, HID), jnp.float32),
                         _chw_to_hwc_rows(w1_2[DX:], C2, IMG // 4, IMG // 4)], axis=1).astype(bf),
        jnp.concatenate([b1_1, b1_2]).reshape(1, -1),
        # block-diagonal W2 / W3 keep the two layers' nets independent
        jnp.concatenate([jnp.concatenate([w2_1, zh], axis=1),
                         jnp.concatenate([zh, w2_2], axis=1)], axis=0).astype(bf),
        jnp.concatenate([b2_1, b2_2]).reshape(1, -1),
        jnp.concatenate([jnp.concatenate([w3_1, z1], axis=1),
                         jnp.concatenate([z1, w3_2], axis=1)], axis=0).astype(bf),
        jnp.concatenate([b3_1, b3_2]).reshape(1, -1),
    )
    return {
        "wb1": _banded_taps(params["conv1_w"], IMG),
        "cb1": jnp.tile(params["conv1_b"], IMG).reshape(1, -1),
        "wb2": _banded_taps(params["conv2_w"], IMG // 2),
        "cb2": jnp.tile(params["conv2_b"], IMG // 2).reshape(1, -1),
        "mine": mine,
    }


# --------------------------------- main -------------------------------------

if __name__ == "__main__":
    root = jax.random.PRNGKey(0)
    k_x, k_p, k_perm = jax.random.split(root, 3)

    x = jax.random.normal(k_x, (2, CIN, IMG, IMG), jnp.float32)   # NCHW, like PyTorch
    params, cfg_params = init_params(k_p)
    prep = prepare_params(params, cfg_params)                     # one-time weight packing

    fwd = jax.jit(mime_vgg_forward)
    t, t_shuffled = jax.block_until_ready(fwd(prep, x, k_perm))

    for layer in ("block1", "block2"):
        assert t[layer].shape == (2, 1) and t_shuffled[layer].shape == (2, 1)
        assert bool(jnp.all(jnp.isfinite(t[layer])))
        assert bool(jnp.all(jnp.isfinite(t_shuffled[layer])))
    print("KERNEL_OK")
</pallas_src>

<mosaic_0001>
module attributes {stable_mosaic.version = 11 : i64} {
  func.func @_vgg_kernel(%arg0: i32, %arg1: memref<2x16x64xbf16, #tpu.memory_space<vmem>>, %arg2: memref<3x72x128xbf16, #tpu.memory_space<vmem>>, %arg3: memref<1x128xf32, #tpu.memory_space<vmem>>, %arg4: memref<16x32xbf16, #tpu.memory_space<vmem>>, %arg5: memref<16x32xbf16, #tpu.memory_space<vmem>>, %arg6: memref<128x64xbf16, #tpu.memory_space<vmem>>, %arg7: memref<3x80x128xbf16, #tpu.memory_space<vmem>>, %arg8: memref<1x128xf32, #tpu.memory_space<vmem>>, %arg9: memref<8x16xbf16, #tpu.memory_space<vmem>>, %arg10: memref<8x16xbf16, #tpu.memory_space<vmem>>, %arg11: memref<128x64xbf16, #tpu.memory_space<vmem>>, %arg12: memref<16x64xbf16, #tpu.memory_space<vmem>>, %arg13: memref<8x64xbf16, #tpu.memory_space<vmem>>, %arg14: memref<2x18x72xbf16, #tpu.memory_space<vmem>>, %arg15: memref<2x10x80xbf16, #tpu.memory_space<vmem>>) attributes {dimension_semantics = [#tpu.dimension_semantics<parallel>], iteration_bounds = array<i64: 1>, scalar_prefetch = 0 : i64, scratch_operands = 2 : i64, tpu.core_type = #tpu.core_type<tc>, window_params = [{transform_indices = @transform_0, window_bounds = array<i64: 2, 16, 64>}, {pipeline_mode = #tpu.pipeline_mode<synchronous>, transform_indices = @transform_1, window_bounds = array<i64: 3, 72, 128>}, {pipeline_mode = #tpu.pipeline_mode<synchronous>, transform_indices = @transform_2, window_bounds = array<i64: 1, 128>}, {pipeline_mode = #tpu.pipeline_mode<synchronous>, transform_indices = @transform_3, window_bounds = array<i64: 16, 32>}, {pipeline_mode = #tpu.pipeline_mode<synchronous>, transform_indices = @transform_4, window_bounds = array<i64: 16, 32>}, {pipeline_mode = #tpu.pipeline_mode<synchronous>, transform_indices = @transform_5, window_bounds = array<i64: 128, 64>}, {pipeline_mode = #tpu.pipeline_mode<synchronous>, transform_indices = @transform_6, window_bounds = array<i64: 3, 80, 128>}, {pipeline_mode = #tpu.pipeline_mode<synchronous>, transform_indices = @transform_7, window_bounds = array<i64: 1, 128>}, {pipeline_mode = #tpu.pipeline_mode<synchronous>, transform_indices = @transform_8, window_bounds = array<i64: 8, 16>}, {pipeline_mode = #tpu.pipeline_mode<synchronous>, transform_indices = @transform_9, window_bounds = array<i64: 8, 16>}, {pipeline_mode = #tpu.pipeline_mode<synchronous>, transform_indices = @transform_10, window_bounds = array<i64: 128, 64>}, {transform_indices = @transform_11, window_bounds = array<i64: 16, 64>}, {transform_indices = @transform_12, window_bounds = array<i64: 8, 64>}]} {
    %cst = arith.constant 0.000000e+00 : bf16
    %0 = vector.broadcast %cst : bf16 to vector<2x18x72xbf16>
    %c0 = arith.constant 0 : index
    %c0_0 = arith.constant 0 : index
    %c0_1 = arith.constant 0 : index
    %1 = vector.load %arg14[%c0, %c0_0, %c0_1] : memref<2x18x72xbf16, #tpu.memory_space<vmem>>, vector<2x18x72xbf16>
    tpu.vector_store %arg14[%c0, %c0_0, %c0_1], %0 {strides = array<i32>} : memref<2x18x72xbf16, #tpu.memory_space<vmem>>, vector<2x18x72xbf16>,
    %cst_2 = arith.constant 0.000000e+00 : bf16
    %2 = vector.broadcast %cst_2 : bf16 to vector<2x10x80xbf16>
    %c0_3 = arith.constant 0 : index
    %c0_4 = arith.constant 0 : index
    %c0_5 = arith.constant 0 : index
    %3 = vector.load %arg15[%c0_3, %c0_4, %c0_5] : memref<2x10x80xbf16, #tpu.memory_space<vmem>>, vector<2x10x80xbf16>
    tpu.vector_store %arg15[%c0_3, %c0_4, %c0_5], %2 {strides = array<i32>} : memref<2x10x80xbf16, #tpu.memory_space<vmem>>, vector<2x10x80xbf16>,
    %c0_6 = arith.constant 0 : index
    %c0_7 = arith.constant 0 : index
    %c0_8 = arith.constant 0 : index
    %4 = vector.load %arg1[%c0_6, %c0_7, %c0_8] : memref<2x16x64xbf16, #tpu.memory_space<vmem>>, vector<2x16x64xbf16>
    %c0_9 = arith.constant 0 : index
    %c1 = arith.constant 1 : index
    %c4 = arith.constant 4 : index
    %5 = vector.load %arg14[%c0_9, %c1, %c4] : memref<2x18x72xbf16, #tpu.memory_space<vmem>>, vector<2x16x64xbf16>
    tpu.vector_store %arg14[%c0_9, %c1, %c4], %4 {strides = array<i32>} : memref<2x18x72xbf16, #tpu.memory_space<vmem>>, vector<2x16x64xbf16>,
    %cst_10 = arith.constant 0.000000e+00 : f32
    %6 = vector.broadcast %cst_10 : f32 to vector<32x128xf32>
    %c0_11 = arith.constant 0 : index
    %c0_12 = arith.constant 0 : index
    %c0_13 = arith.constant 0 : index
    %7 = vector.load %arg14[%c0_11, %c0_12, %c0_13] : memref<2x18x72xbf16, #tpu.memory_space<vmem>>, vector<2x16x72xbf16>
    %8 = vector.shape_cast %7 : vector<2x16x72xbf16> to vector<32x72xbf16>
    %c0_14 = arith.constant 0 : index
    %c0_15 = arith.constant 0 : index
    %c0_16 = arith.constant 0 : index
    %9 = vector.load %arg2[%c0_14, %c0_15, %c0_16] : memref<3x72x128xbf16, #tpu.memory_space<vmem>>, vector<1x72x128xbf16>
    %10 = vector.shape_cast %9 : vector<1x72x128xbf16> to vector<72x128xbf16>
    %cst_17 = arith.constant dense<0.000000e+00> : vector<32x128xf32>
    %11 = tpu.matmul %8, %10, %cst_17 {dimension_numbers = #tpu.dot_dimension_numbers<[1], [0], [0], [1], [0, 0, 1, 1], [], []>} : vector<32x72xbf16>, vector<72x128xbf16>, vector<32x128xf32> -> vector<32x128xf32>
    %12 = arith.addf %6, %11 : vector<32x128xf32>
    %c0_18 = arith.constant 0 : index
    %c1_19 = arith.constant 1 : index
    %c0_20 = arith.constant 0 : index
    %13 = vector.load %arg14[%c0_18, %c1_19, %c0_20] : memref<2x18x72xbf16, #tpu.memory_space<vmem>>, vector<2x16x72xbf16>
    %14 = vector.shape_cast %13 : vector<2x16x72xbf16> to vector<32x72xbf16>
    %c1_21 = arith.constant 1 : index
    %c0_22 = arith.constant 0 : index
    %c0_23 = arith.constant 0 : index
    %15 = vector.load %arg2[%c1_21, %c0_22, %c0_23] : memref<3x72x128xbf16, #tpu.memory_space<vmem>>, vector<1x72x128xbf16>
    %16 = vector.shape_cast %15 : vector<1x72x128xbf16> to vector<72x128xbf16>
    %cst_24 = arith.constant dense<0.000000e+00> : vector<32x128xf32>
    %17 = tpu.matmul %14, %16, %cst_24 {dimension_numbers = #tpu.dot_dimension_numbers<[1], [0], [0], [1], [0, 0, 1, 1], [], []>} : vector<32x72xbf16>, vector<72x128xbf16>, vector<32x128xf32> -> vector<32x128xf32>
    %18 = arith.addf %12, %17 : vector<32x128xf32>
    %c0_25 = arith.constant 0 : index
    %c2 = arith.constant 2 : index
    %c0_26 = arith.constant 0 : index
    %19 = vector.load %arg14[%c0_25, %c2, %c0_26] : memref<2x18x72xbf16, #tpu.memory_space<vmem>>, vector<2x16x72xbf16>
    %20 = vector.shape_cast %19 : vector<2x16x72xbf16> to vector<32x72xbf16>
    %c2_27 = arith.constant 2 : index
    %c0_28 = arith.constant 0 : index
    %c0_29 = arith.constant 0 : index
    %21 = vector.load %arg2[%c2_27, %c0_28, %c0_29] : memref<3x72x128xbf16, #tpu.memory_space<vmem>>, vector<1x72x128xbf16>
    %22 = vector.shape_cast %21 : vector<1x72x128xbf16> to vector<72x128xbf16>
    %cst_30 = arith.constant dense<0.000000e+00> : vector<32x128xf32>
    %23 = tpu.matmul %20, %22, %cst_30 {dimension_numbers = #tpu.dot_dimension_numbers<[1], [0], [0], [1], [0, 0, 1, 1], [], []>} : vector<32x72xbf16>, vector<72x128xbf16>, vector<32x128xf32> -> vector<32x128xf32>
    %24 = arith.addf %18, %23 : vector<32x128xf32>
    %c0_31 = arith.constant 0 : index
    %c0_32 = arith.constant 0 : index
    %25 = vector.load %arg3[%c0_31, %c0_32] : memref<1x128xf32, #tpu.memory_space<vmem>>, vector<1x128xf32>
    %26 = vector.broadcast %25 : vector<1x128xf32> to vector<32x128xf32>
    %27 = arith.addf %24, %26 : vector<32x128xf32>
    %cst_33 = arith.constant 0.000000e+00 : f32
    %28 = vector.broadcast %cst_33 : f32 to vector<32x128xf32>
    %29 = arith.maximumf %27, %28 : vector<32x128xf32>
    %30 = arith.truncf %29 : vector<32x128xf32> to vector<32x128xbf16>
    %c0_34 = arith.constant 0 : index
    %c0_35 = arith.constant 0 : index
    %31 = vector.load %arg4[%c0_34, %c0_35] : memref<16x32xbf16, #tpu.memory_space<vmem>>, vector<16x32xbf16>
    %cst_36 = arith.constant dense<0.000000e+00> : vector<16x128xf32>
    %32 = tpu.matmul %31, %30, %cst_36 {dimension_numbers = #tpu.dot_dimension_numbers<[1], [0], [0], [1], [0, 0, 1, 1], [], []>} : vector<16x32xbf16>, vector<32x128xbf16>, vector<16x128xf32> -> vector<16x128xf32>
    %c0_37 = arith.constant 0 : index
    %c0_38 = arith.constant 0 : index
    %33 = vector.load %arg5[%c0_37, %c0_38] : memref<16x32xbf16, #tpu.memory_space<vmem>>, vector<16x32xbf16>
    %cst_39 = arith.constant dense<0.000000e+00> : vector<16x128xf32>
    %34 = tpu.matmul %33, %30, %cst_39 {dimension_numbers = #tpu.dot_dimension_numbers<[1], [0], [0], [1], [0, 0, 1, 1], [], []>} : vector<16x32xbf16>, vector<32x128xbf16>, vector<16x128xf32> -> vector<16x128xf32>
    %35 = arith.maximumf %32, %34 : vector<16x128xf32>
    %c120_i32 = arith.constant 120 : i32
    %36 = tpu.dynamic_rotate %35 by %c120_i32 dim 1 : vector<16x128xf32>, i32 -> vector<16x128xf32>
    %37 = arith.maximumf %35, %36 : vector<16x128xf32>
    %38 = arith.truncf %37 : vector<16x128xf32> to vector<16x128xbf16>
    %c0_40 = arith.constant 0 : index
    %c0_41 = arith.constant 0 : index
    %39 = vector.load %arg6[%c0_40, %c0_41] : memref<128x64xbf16, #tpu.memory_space<vmem>>, vector<128x64xbf16>
    %cst_42 = arith.constant dense<0.000000e+00> : vector<16x64xf32>
    %40 = tpu.matmul %38, %39, %cst_42 {dimension_numbers = #tpu.dot_dimension_numbers<[1], [0], [0], [1], [0, 0, 1, 1], [], []>} : vector<16x128xbf16>, vector<128x64xbf16>, vector<16x64xf32> -> vector<16x64xf32>
    %41 = arith.truncf %40 : vector<16x64xf32> to vector<16x64xbf16>
    %c0_43 = arith.constant 0 : index
    %c0_44 = arith.constant 0 : index
    %42 = vector.load %arg12[%c0_43, %c0_44] : memref<16x64xbf16, #tpu.memory_space<vmem>>, vector<16x64xbf16>
    tpu.vector_store %arg12[%c0_43, %c0_44], %41 {strides = array<i32>} : memref<16x64xbf16, #tpu.memory_space<vmem>>, vector<16x64xbf16>,
    %43 = vector.shape_cast %41 : vector<16x64xbf16> to vector<2x8x64xbf16>
    %c0_45 = arith.constant 0 : index
    %c1_46 = arith.constant 1 : index
    %c8 = arith.constant 8 : index
    %44 = vector.load %arg15[%c0_45, %c1_46, %c8] : memref<2x10x80xbf16, #tpu.memory_space<vmem>>, vector<2x8x64xbf16>
    tpu.vector_store %arg15[%c0_45, %c1_46, %c8], %43 {strides = array<i32>} : memref<2x10x80xbf16, #tpu.memory_space<vmem>>, vector<2x8x64xbf16>,
    %cst_47 = arith.constant 0.000000e+00 : f32
    %45 = vector.broadcast %cst_47 : f32 to vector<16x128xf32>
    %c0_48 = arith.constant 0 : index
    %c0_49 = arith.constant 0 : index
    %c0_50 = arith.constant 0 : index
    %46 = vector.load %arg15[%c0_48, %c0_49, %c0_50] : memref<2x10x80xbf16, #tpu.memory_space<vmem>>, vector<2x8x80xbf16>
    %47 = vector.shape_cast %46 : vector<2x8x80xbf16> to vector<16x80xbf16>
    %c0_51 = arith.constant 0 : index
    %c0_52 = arith.constant 0 : index
    %c0_53 = arith.constant 0 : index
    %48 = vector.load %arg7[%c0_51, %c0_52, %c0_53] : memref<3x80x128xbf16, #tpu.memory_space<vmem>>, vector<1x80x128xbf16>
    %49 = vector.shape_cast %48 : vector<1x80x128xbf16> to vector<80x128xbf16>
    %cst_54 = arith.constant dense<0.000000e+00> : vector<16x128xf32>
    %50 = tpu.matmul %47, %49, %cst_54 {dimension_numbers = #tpu.dot_dimension_numbers<[1], [0], [0], [1], [0, 0, 1, 1], [], []>} : vector<16x80xbf16>, vector<80x128xbf16>, vector<16x128xf32> -> vector<16x128xf32>
    %51 = arith.addf %45, %50 : vector<16x128xf32>
    %c0_55 = arith.constant 0 : index
    %c1_56 = arith.constant 1 : index
    %c0_57 = arith.constant 0 : index
    %52 = vector.load %arg15[%c0_55, %c1_56, %c0_57] : memref<2x10x80xbf16, #tpu.memory_space<vmem>>, vector<2x8x80xbf16>
    %53 = vector.shape_cast %52 : vector<2x8x80xbf16> to vector<16x80xbf16>
    %c1_58 = arith.constant 1 : index
    %c0_59 = arith.constant 0 : index
    %c0_60 = arith.constant 0 : index
    %54 = vector.load %arg7[%c1_58, %c0_59, %c0_60] : memref<3x80x128xbf16, #tpu.memory_space<vmem>>, vector<1x80x128xbf16>
    %55 = vector.shape_cast %54 : vector<1x80x128xbf16> to vector<80x128xbf16>
    %cst_61 = arith.constant dense<0.000000e+00> : vector<16x128xf32>
    %56 = tpu.matmul %53, %55, %cst_61 {dimension_numbers = #tpu.dot_dimension_numbers<[1], [0], [0], [1], [0, 0, 1, 1], [], []>} : vector<16x80xbf16>, vector<80x128xbf16>, vector<16x128xf32> -> vector<16x128xf32>
    %57 = arith.addf %51, %56 : vector<16x128xf32>
    %c0_62 = arith.constant 0 : index
    %c2_63 = arith.constant 2 : index
    %c0_64 = arith.constant 0 : index
    %58 = vector.load %arg15[%c0_62, %c2_63, %c0_64] : memref<2x10x80xbf16, #tpu.memory_space<vmem>>, vector<2x8x80xbf16>
    %59 = vector.shape_cast %58 : vector<2x8x80xbf16> to vector<16x80xbf16>
    %c2_65 = arith.constant 2 : index
    %c0_66 = arith.constant 0 : index
    %c0_67 = arith.constant 0 : index
    %60 = vector.load %arg7[%c2_65, %c0_66, %c0_67] : memref<3x80x128xbf16, #tpu.memory_space<vmem>>, vector<1x80x128xbf16>
    %61 = vector.shape_cast %60 : vector<1x80x128xbf16> to vector<80x128xbf16>
    %cst_68 = arith.constant dense<0.000000e+00> : vector<16x128xf32>
    %62 = tpu.matmul %59, %61, %cst_68 {dimension_numbers = #tpu.dot_dimension_numbers<[1], [0], [0], [1], [0, 0, 1, 1], [], []>} : vector<16x80xbf16>, vector<80x128xbf16>, vector<16x128xf32> -> vector<16x128xf32>
    %63 = arith.addf %57, %62 : vector<16x128xf32>
    %c0_69 = arith.constant 0 : index
    %c0_70 = arith.constant 0 : index
    %64 = vector.load %arg8[%c0_69, %c0_70] : memref<1x128xf32, #tpu.memory_space<vmem>>, vector<1x128xf32>
    %65 = vector.broadcast %64 : vector<1x128xf32> to vector<16x128xf32>
    %66 = arith.addf %63, %65 : vector<16x128xf32>
    %cst_71 = arith.constant 0.000000e+00 : f32
    %67 = vector.broadcast %cst_71 : f32 to vector<16x128xf32>
    %68 = arith.maximumf %66, %67 : vector<16x128xf32>
    %69 = arith.truncf %68 : vector<16x128xf32> to vector<16x128xbf16>
    %c0_72 = arith.constant 0 : index
    %c0_73 = arith.constant 0 : index
    %70 = vector.load %arg9[%c0_72, %c0_73] : memref<8x16xbf16, #tpu.memory_space<vmem>>, vector<8x16xbf16>
    %cst_74 = arith.constant dense<0.000000e+00> : vector<8x128xf32>
    %71 = tpu.matmul %70, %69, %cst_74 {dimension_numbers = #tpu.dot_dimension_numbers<[1], [0], [0], [1], [0, 0, 1, 1], [], []>} : vector<8x16xbf16>, vector<16x128xbf16>, vector<8x128xf32> -> vector<8x128xf32>
    %c0_75 = arith.constant 0 : index
    %c0_76 = arith.constant 0 : index
    %72 = vector.load %arg10[%c0_75, %c0_76] : memref<8x16xbf16, #tpu.memory_space<vmem>>, vector<8x16xbf16>
    %cst_77 = arith.constant dense<0.000000e+00> : vector<8x128xf32>
    %73 = tpu.matmul %72, %69, %cst_77 {dimension_numbers = #tpu.dot_dimension_numbers<[1], [0], [0], [1], [0, 0, 1, 1], [], []>} : vector<8x16xbf16>, vector<16x128xbf16>, vector<8x128xf32> -> vector<8x128xf32>
    %74 = arith.maximumf %71, %73 : vector<8x128xf32>
    %c112_i32 = arith.constant 112 : i32
    %75 = tpu.dynamic_rotate %74 by %c112_i32 dim 1 : vector<8x128xf32>, i32 -> vector<8x128xf32>
    %76 = arith.maximumf %74, %75 : vector<8x128xf32>
    %77 = arith.truncf %76 : vector<8x128xf32> to vector<8x128xbf16>
    %c0_78 = arith.constant 0 : index
    %c0_79 = arith.constant 0 : index
    %78 = vector.load %arg11[%c0_78, %c0_79] : memref<128x64xbf16, #tpu.memory_space<vmem>>, vector<128x64xbf16>
    %cst_80 = arith.constant dense<0.000000e+00> : vector<8x64xf32>
    %79 = tpu.matmul %77, %78, %cst_80 {dimension_numbers = #tpu.dot_dimension_numbers<[1], [0], [0], [1], [0, 0, 1, 1], [], []>} : vector<8x128xbf16>, vector<128x64xbf16>, vector<8x64xf32> -> vector<8x64xf32>
    %80 = arith.truncf %79 : vector<8x64xf32> to vector<8x64xbf16>
    %c0_81 = arith.constant 0 : index
    %c0_82 = arith.constant 0 : index
    %81 = vector.load %arg13[%c0_81, %c0_82] : memref<8x64xbf16, #tpu.memory_space<vmem>>, vector<8x64xbf16>
    tpu.vector_store %arg13[%c0_81, %c0_82], %80 {strides = array<i32>} : memref<8x64xbf16, #tpu.memory_space<vmem>>, vector<8x64xbf16>,
    return
  }
  func.func @transform_0(%arg0: i32) -> (i32, i32, i32) {
    %c0_i32 = arith.constant 0 : i32
    %c0_i32_0 = arith.constant 0 : i32
    %c0_i32_1 = arith.constant 0 : i32
    return %arg0, %c0_i32, %c0_i32_0 : i32, i32, i32
  }
  func.func @transform_1(%arg0: i32) -> (i32, i32, i32) {
    %c0_i32 = arith.constant 0 : i32
    %c0_i32_0 = arith.constant 0 : i32
    %c0_i32_1 = arith.constant 0 : i32
    %c0_i32_2 = arith.constant 0 : i32
    return %c0_i32, %c0_i32_0, %c0_i32_1 : i32, i32, i32
  }
  func.func @transform_2(%arg0: i32) -> (i32, i32) {
    %c0_i32 = arith.constant 0 : i32
    %c0_i32_0 = arith.constant 0 : i32
    %c0_i32_1 = arith.constant 0 : i32
    return %c0_i32, %c0_i32_0 : i32, i32
  }
  func.func @transform_3(%arg0: i32) -> (i32, i32) {
    %c0_i32 = arith.constant 0 : i32
    %c0_i32_0 = arith.constant 0 : i32
    %c0_i32_1 = arith.constant 0 : i32
    return %c0_i32, %c0_i32_0 : i32, i32
  }
  func.func @transform_4(%arg0: i32) -> (i32, i32) {
    %c0_i32 = arith.constant 0 : i32
    %c0_i32_0 = arith.constant 0 : i32
    %c0_i32_1 = arith.constant 0 : i32
    return %c0_i32, %c0_i32_0 : i32, i32
  }
  func.func @transform_5(%arg0: i32) -> (i32, i32) {
    %c0_i32 = arith.constant 0 : i32
    %c0_i32_0 = arith.constant 0 : i32
    %c0_i32_1 = arith.constant 0 : i32
    return %c0_i32, %c0_i32_0 : i32, i32
  }
  func.func @transform_6(%arg0: i32) -> (i32, i32, i32) {
    %c0_i32 = arith.constant 0 : i32
    %c0_i32_0 = arith.constant 0 : i32
    %c0_i32_1 = arith.constant 0 : i32
    %c0_i32_2 = arith.constant 0 : i32
    return %c0_i32, %c0_i32_0, %c0_i32_1 : i32, i32, i32
  }
  func.func @transform_7(%arg0: i32) -> (i32, i32) {
    %c0_i32 = arith.constant 0 : i32
    %c0_i32_0 = arith.constant 0 : i32
    %c0_i32_1 = arith.constant 0 : i32
    return %c0_i32, %c0_i32_0 : i32, i32
  }
  func.func @transform_8(%arg0: i32) -> (i32, i32) {
    %c0_i32 = arith.constant 0 : i32
    %c0_i32_0 = arith.constant 0 : i32
    %c0_i32_1 = arith.constant 0 : i32
    return %c0_i32, %c0_i32_0 : i32, i32
  }
  func.func @transform_9(%arg0: i32) -> (i32, i32) {
    %c0_i32 = arith.constant 0 : i32
    %c0_i32_0 = arith.constant 0 : i32
    %c0_i32_1 = arith.constant 0 : i32
    return %c0_i32, %c0_i32_0 : i32, i32
  }
  func.func @transform_10(%arg0: i32) -> (i32, i32) {
    %c0_i32 = arith.constant 0 : i32
    %c0_i32_0 = arith.constant 0 : i32
    %c0_i32_1 = arith.constant 0 : i32
    return %c0_i32, %c0_i32_0 : i32, i32
  }
  func.func @transform_11(%arg0: i32) -> (i32, i32) {
    %c0_i32 = arith.constant 0 : i32
    %c0_i32_0 = arith.constant 0 : i32
    return %arg0, %c0_i32 : i32, i32
  }
  func.func @transform_12(%arg0: i32) -> (i32, i32) {
    %c0_i32 = arith.constant 0 : i32
    %c0_i32_0 = arith.constant 0 : i32
    return %arg0, %c0_i32 : i32, i32
  }
}

module attributes {stable_mosaic.version = 11 : i64} {
  func.func @_mine_kernel(%arg0: i32, %arg1: memref<2x1024xbf16, #tpu.memory_space<vmem>>, %arg2: memref<2x512xbf16, #tpu.memory_space<vmem>>, %arg3: memref<2x512xbf16, #tpu.memory_space<vmem>>, %arg4: memref<2x256xbf16, #tpu.memory_space<vmem>>, %arg5: memref<2x256xbf16, #tpu.memory_space<vmem>>, %arg6: memref<1024x128xbf16, #tpu.memory_space<vmem>>, %arg7: memref<512x128xbf16, #tpu.memory_space<vmem>>, %arg8: memref<256x128xbf16, #tpu.memory_space<vmem>>, %arg9: memref<1x128xf32, #tpu.memory_space<vmem>>, %arg10: memref<128x128xbf16, #tpu.memory_space<vmem>>, %arg11: memref<1x128xf32, #tpu.memory_space<vmem>>, %arg12: memref<128x2xbf16, #tpu.memory_space<vmem>>, %arg13: memref<1x2xf32, #tpu.memory_space<vmem>>, %arg14: memref<2x4xf32, #tpu.memory_space<vmem>>) attributes {dimension_semantics = [#tpu.dimension_semantics<parallel>], iteration_bounds = array<i64: 1>, scalar_prefetch = 0 : i64, scratch_operands = 0 : i64, tpu.core_type = #tpu.core_type<tc>, window_params = [{transform_indices = @transform_0, window_bounds = array<i64: 2, 1024>}, {transform_indices = @transform_1, window_bounds = array<i64: 2, 512>}, {transform_indices = @transform_2, window_bounds = array<i64: 2, 512>}, {transform_indices = @transform_3, window_bounds = array<i64: 2, 256>}, {transform_indices = @transform_4, window_bounds = array<i64: 2, 256>}, {pipeline_mode = #tpu.pipeline_mode<synchronous>, transform_indices = @transform_5, window_bounds = array<i64: 1024, 128>}, {pipeline_mode = #tpu.pipeline_mode<synchronous>, transform_indices = @transform_6, window_bounds = array<i64: 512, 128>}, {pipeline_mode = #tpu.pipeline_mode<synchronous>, transform_indices = @transform_7, window_bounds = array<i64: 256, 128>}, {pipeline_mode = #tpu.pipeline_mode<synchronous>, transform_indices = @transform_8, window_bounds = array<i64: 1, 128>}, {pipeline_mode = #tpu.pipeline_mode<synchronous>, transform_indices = @transform_9, window_bounds = array<i64: 128, 128>}, {pipeline_mode = #tpu.pipeline_mode<synchronous>, transform_indices = @transform_10, window_bounds = array<i64: 1, 128>}, {pipeline_mode = #tpu.pipeline_mode<synchronous>, transform_indices = @transform_11, window_bounds = array<i64: 128, 2>}, {pipeline_mode = #tpu.pipeline_mode<synchronous>, transform_indices = @transform_12, window_bounds = array<i64: 1, 2>}, {transform_indices = @transform_13, window_bounds = array<i64: 2, 4>}]} {
    %c0 = arith.constant 0 : index
    %c0_0 = arith.constant 0 : index
    %0 = vector.load %arg1[%c0, %c0_0] : memref<2x1024xbf16, #tpu.memory_space<vmem>>, vector<2x1024xbf16>
    %c0_1 = arith.constant 0 : index
    %c0_2 = arith.constant 0 : index
    %1 = vector.load %arg6[%c0_1, %c0_2] : memref<1024x128xbf16, #tpu.memory_space<vmem>>, vector<1024x128xbf16>
    %cst = arith.constant dense<0.000000e+00> : vector<2x128xf32>
    %2 = tpu.matmul %0, %1, %cst {dimension_numbers = #tpu.dot_dimension_numbers<[1], [0], [0], [1], [0, 0, 1, 1], [], []>} : vector<2x1024xbf16>, vector<1024x128xbf16>, vector<2x128xf32> -> vector<2x128xf32>
    %c0_3 = arith.constant 0 : index
    %c0_4 = arith.constant 0 : index
    %3 = vector.load %arg2[%c0_3, %c0_4] : memref<2x512xbf16, #tpu.memory_space<vmem>>, vector<2x512xbf16>
    %c0_5 = arith.constant 0 : index
    %c0_6 = arith.constant 0 : index
    %4 = vector.load %arg7[%c0_5, %c0_6] : memref<512x128xbf16, #tpu.memory_space<vmem>>, vector<512x128xbf16>
    %cst_7 = arith.constant dense<0.000000e+00> : vector<2x128xf32>
    %5 = tpu.matmul %3, %4, %cst_7 {dimension_numbers = #tpu.dot_dimension_numbers<[1], [0], [0], [1], [0, 0, 1, 1], [], []>} : vector<2x512xbf16>, vector<512x128xbf16>, vector<2x128xf32> -> vector<2x128xf32>
    %c0_8 = arith.constant 0 : index
    %c0_9 = arith.constant 0 : index
    %6 = vector.load %arg4[%c0_8, %c0_9] : memref<2x256xbf16, #tpu.memory_space<vmem>>, vector<2x256xbf16>
    %c0_10 = arith.constant 0 : index
    %c0_11 = arith.constant 0 : index
    %7 = vector.load %arg8[%c0_10, %c0_11] : memref<256x128xbf16, #tpu.memory_space<vmem>>, vector<256x128xbf16>
    %cst_12 = arith.constant dense<0.000000e+00> : vector<2x128xf32>
    %8 = tpu.matmul %6, %7, %cst_12 {dimension_numbers = #tpu.dot_dimension_numbers<[1], [0], [0], [1], [0, 0, 1, 1], [], []>} : vector<2x256xbf16>, vector<256x128xbf16>, vector<2x128xf32> -> vector<2x128xf32>
    %9 = arith.addf %5, %8 : vector<2x128xf32>
    %c0_13 = arith.constant 0 : index
    %c0_14 = arith.constant 0 : index
    %10 = vector.load %arg3[%c0_13, %c0_14] : memref<2x512xbf16, #tpu.memory_space<vmem>>, vector<2x512xbf16>
    %c0_15 = arith.constant 0 : index
    %c0_16 = arith.constant 0 : index
    %11 = vector.load %arg7[%c0_15, %c0_16] : memref<512x128xbf16, #tpu.memory_space<vmem>>, vector<512x128xbf16>
    %cst_17 = arith.constant dense<0.000000e+00> : vector<2x128xf32>
    %12 = tpu.matmul %10, %11, %cst_17 {dimension_numbers = #tpu.dot_dimension_numbers<[1], [0], [0], [1], [0, 0, 1, 1], [], []>} : vector<2x512xbf16>, vector<512x128xbf16>, vector<2x128xf32> -> vector<2x128xf32>
    %c0_18 = arith.constant 0 : index
    %c0_19 = arith.constant 0 : index
    %13 = vector.load %arg5[%c0_18, %c0_19] : memref<2x256xbf16, #tpu.memory_space<vmem>>, vector<2x256xbf16>
    %c0_20 = arith.constant 0 : index
    %c0_21 = arith.constant 0 : index
    %14 = vector.load %arg8[%c0_20, %c0_21] : memref<256x128xbf16, #tpu.memory_space<vmem>>, vector<256x128xbf16>
    %cst_22 = arith.constant dense<0.000000e+00> : vector<2x128xf32>
    %15 = tpu.matmul %13, %14, %cst_22 {dimension_numbers = #tpu.dot_dimension_numbers<[1], [0], [0], [1], [0, 0, 1, 1], [], []>} : vector<2x256xbf16>, vector<256x128xbf16>, vector<2x128xf32> -> vector<2x128xf32>
    %16 = arith.addf %12, %15 : vector<2x128xf32>
    %17 = arith.addf %2, %9 : vector<2x128xf32>
    %18 = arith.addf %2, %16 : vector<2x128xf32>
    %19 = tpu.concatenate %17, %18 in 0 : vector<2x128xf32>, vector<2x128xf32> -> vector<4x128xf32>
    %c0_23 = arith.constant 0 : index
    %c0_24 = arith.constant 0 : index
    %20 = vector.load %arg9[%c0_23, %c0_24] : memref<1x128xf32, #tpu.memory_space<vmem>>, vector<1x128xf32>
    %21 = vector.broadcast %20 : vector<1x128xf32> to vector<4x128xf32>
    %22 = arith.addf %19, %21 : vector<4x128xf32>
    %cst_25 = arith.constant 0.000000e+00 : f32
    %23 = vector.broadcast %cst_25 : f32 to vector<4x128xf32>
    %24 = arith.maximumf %22, %23 : vector<4x128xf32>
    %25 = arith.truncf %24 : vector<4x128xf32> to vector<4x128xbf16>
    %c0_26 = arith.constant 0 : index
    %c0_27 = arith.constant 0 : index
    %26 = vector.load %arg10[%c0_26, %c0_27] : memref<128x128xbf16, #tpu.memory_space<vmem>>, vector<128x128xbf16>
    %cst_28 = arith.constant dense<0.000000e+00> : vector<4x128xf32>
    %27 = tpu.matmul %25, %26, %cst_28 {dimension_numbers = #tpu.dot_dimension_numbers<[1], [0], [0], [1], [0, 0, 1, 1], [], []>} : vector<4x128xbf16>, vector<128x128xbf16>, vector<4x128xf32> -> vector<4x128xf32>
    %c0_29 = arith.constant 0 : index
    %c0_30 = arith.constant 0 : index
    %28 = vector.load %arg11[%c0_29, %c0_30] : memref<1x128xf32, #tpu.memory_space<vmem>>, vector<1x128xf32>
    %29 = vector.broadcast %28 : vector<1x128xf32> to vector<4x128xf32>
    %30 = arith.addf %27, %29 : vector<4x128xf32>
    %cst_31 = arith.constant 0.000000e+00 : f32
    %31 = vector.broadcast %cst_31 : f32 to vector<4x128xf32>
    %32 = arith.maximumf %30, %31 : vector<4x128xf32>
    %33 = arith.truncf %32 : vector<4x128xf32> to vector<4x128xbf16>
    %c0_32 = arith.constant 0 : index
    %c0_33 = arith.constant 0 : index
    %34 = vector.load %arg12[%c0_32, %c0_33] : memref<128x2xbf16, #tpu.memory_space<vmem>>, vector<128x2xbf16>
    %cst_34 = arith.constant dense<0.000000e+00> : vector<4x2xf32>
    %35 = tpu.matmul %33, %34, %cst_34 {dimension_numbers = #tpu.dot_dimension_numbers<[1], [0], [0], [1], [0, 0, 1, 1], [], []>} : vector<4x128xbf16>, vector<128x2xbf16>, vector<4x2xf32> -> vector<4x2xf32>
    %c0_35 = arith.constant 0 : index
    %c0_36 = arith.constant 0 : index
    %36 = vector.load %arg13[%c0_35, %c0_36] : memref<1x2xf32, #tpu.memory_space<vmem>>, vector<1x2xf32>
    %37 = vector.broadcast %36 : vector<1x2xf32> to vector<4x2xf32>
    %38 = arith.addf %35, %37 : vector<4x2xf32>
    %39 = vector.extract_strided_slice %38 {offsets = [0, 0], sizes = [2, 2], strides = [1, 1]} : vector<4x2xf32> to vector<2x2xf32>
    %c0_37 = arith.constant 0 : index
    %c0_38 = arith.constant 0 : index
    %40 = vector.load %arg14[%c0_37, %c0_38] : memref<2x4xf32, #tpu.memory_space<vmem>>, vector<2x2xf32>
    tpu.vector_store %arg14[%c0_37, %c0_38], %39 {strides = array<i32>} : memref<2x4xf32, #tpu.memory_space<vmem>>, vector<2x2xf32>,
    %41 = vector.extract_strided_slice %38 {offsets = [2, 0], sizes = [2, 2], strides = [1, 1]} : vector<4x2xf32> to vector<2x2xf32>
    %c0_39 = arith.constant 0 : index
    %c2 = arith.constant 2 : index
    %42 = vector.load %arg14[%c0_39, %c2] : memref<2x4xf32, #tpu.memory_space<vmem>>, vector<2x2xf32>
    tpu.vector_store %arg14[%c0_39, %c2], %41 {strides = array<i32>} : memref<2x4xf32, #tpu.memory_space<vmem>>, vector<2x2xf32>,
    return
  }
  func.func @transform_0(%arg0: i32) -> (i32, i32) {
    %c0_i32 = arith.constant 0 : i32
    %c0_i32_0 = arith.constant 0 : i32
    return %arg0, %c0_i32 : i32, i32
  }
  func.func @transform_1(%arg0: i32) -> (i32, i32) {
    %c0_i32 = arith.constant 0 : i32
    %c0_i32_0 = arith.constant 0 : i32
    return %arg0, %c0_i32 : i32, i32
  }
  func.func @transform_2(%arg0: i32) -> (i32, i32) {
    %c0_i32 = arith.constant 0 : i32
    %c0_i32_0 = arith.constant 0 : i32
    return %arg0, %c0_i32 : i32, i32
  }
  func.func @transform_3(%arg0: i32) -> (i32, i32) {
    %c0_i32 = arith.constant 0 : i32
    %c0_i32_0 = arith.constant 0 : i32
    return %arg0, %c0_i32 : i32, i32
  }
  func.func @transform_4(%arg0: i32) -> (i32, i32) {
    %c0_i32 = arith.constant 0 : i32
    %c0_i32_0 = arith.constant 0 : i32
    return %arg0, %c0_i32 : i32, i32
  }
  func.func @transform_5(%arg0: i32) -> (i32, i32) {
    %c0_i32 = arith.constant 0 : i32
    %c0_i32_0 = arith.constant 0 : i32
    %c0_i32_1 = arith.constant 0 : i32
    return %c0_i32, %c0_i32_0 : i32, i32
  }
  func.func @transform_6(%arg0: i32) -> (i32, i32) {
    %c0_i32 = arith.constant 0 : i32
    %c0_i32_0 = arith.constant 0 : i32
    %c0_i32_1 = arith.constant 0 : i32
    return %c0_i32, %c0_i32_0 : i32, i32
  }
  func.func @transform_7(%arg0: i32) -> (i32, i32) {
    %c0_i32 = arith.constant 0 : i32
    %c0_i32_0 = arith.constant 0 : i32
    %c0_i32_1 = arith.constant 0 : i32
    return %c0_i32, %c0_i32_0 : i32, i32
  }
  func.func @transform_8(%arg0: i32) -> (i32, i32) {
    %c0_i32 = arith.constant 0 : i32
    %c0_i32_0 = arith.constant 0 : i32
    %c0_i32_1 = arith.constant 0 : i32
    return %c0_i32, %c0_i32_0 : i32, i32
  }
  func.func @transform_9(%arg0: i32) -> (i32, i32) {
    %c0_i32 = arith.constant 0 : i32
    %c0_i32_0 = arith.constant 0 : i32
    %c0_i32_1 = arith.constant 0 : i32
    return %c0_i32, %c0_i32_0 : i32, i32
  }
  func.func @transform_10(%arg0: i32) -> (i32, i32) {
    %c0_i32 = arith.constant 0 : i32
    %c0_i32_0 = arith.constant 0 : i32
    %c0_i32_1 = arith.constant 0 : i32
    return %c0_i32, %c0_i32_0 : i32, i32
  }
  func.func @transform_11(%arg0: i32) -> (i32, i32) {
    %c0_i32 = arith.constant 0 : i32
    %c0_i32_0 = arith.constant 0 : i32
    %c0_i32_1 = arith.constant 0 : i32
    return %c0_i32, %c0_i32_0 : i32, i32
  }
  func.func @transform_12(%arg0: i32) -> (i32, i32) {
    %c0_i32 = arith.constant 0 : i32
    %c0_i32_0 = arith.constant 0 : i32
    %c0_i32_1 = arith.constant 0 : i32
    return %c0_i32, %c0_i32_0 : i32, i32
  }
  func.func @transform_13(%arg0: i32) -> (i32, i32) {
    %c0_i32 = arith.constant 0 : i32
    %c0_i32_0 = arith.constant 0 : i32
    return %arg0, %c0_i32 : i32, i32
  }
}

</mosaic_0001>

<bundles_post_ra>
// kernel: mime_vgg_forward.2
= control target key start
LH: loop header
LB: loop body
LE: loop exit
PB: predicated region body
PF: predicated region fallthrough
CT: control target
= control target key end

     0   :  { %vm59_vm0 = vsmask.f32 256  ;;  %vm60_vm1 = vsmask.f32 4368  ;;  %vm41_vm2 = vcmask 584704   ;;  %v1760_v16 = vmov 0   ;;  %s2159_s0 = inlined_call_operand.vmem [shape: bf16[2,16,64], index: 0, kind: input, shape index: {}]   ;;  %s2160_s1 = inlined_call_operand.vmem [shape: bf16[3,72,128], index: 1, kind: input, shape index: {}]   ;;  %s2161_s3 = inlined_call_operand.vmem [shape: bf16[16,32], index: 3, kind: input, shape index: {}]   ;;  %s2162_s4 = inlined_call_operand.vmem [shape: bf16[16,32], index: 4, kind: input, shape index: {}]   ;;  %s2163_s2 = inlined_call_operand.vmem [shape: f32[1,128], index: 2, kind: input, shape index: {}]   ;;  %s2164_s5 = inlined_call_operand.vmem [shape: bf16[128,64], index: 5, kind: input, shape index: {}]   ;;  %s2165_s6 = inlined_call_operand.vmem [shape: bf16[3,80,128], index: 6, kind: input, shape index: {}]   ;;  %s2166_s11 = inlined_call_operand.vmem [shape: bf16[16,64], index: 11, kind: output, shape index: {0}]   ;;  %s2167_s7 = inlined_call_operand.vmem [shape: f32[1,128], index: 7, kind: input, shape index: {}]   ;;  %s2168_s8 = inlined_call_operand.vmem [shape: bf16[8,16], index: 8, kind: input, shape index: {}]   ;;  %s2169_s9 = inlined_call_operand.vmem [shape: bf16[8,16], index: 9, kind: input, shape index: {}]   ;;  %s2170_s10 = inlined_call_operand.vmem [shape: bf16[128,64], index: 10, kind: input, shape index: {}]   ;;  %s2171_s12 = inlined_call_operand.vmem [shape: bf16[8,64], index: 12, kind: output, shape index: {1}]  }
   0x1   :  { %v57_v0 = vld [vmem:[%s2159_s0 + $0x8] sm:$0xf]  ;;  %v55_v1 = vld [vmem:[%s2159_s0] sm:$0xf]  ;;  %v58_v2 = vld [vmem:[%s2159_s0 + $0xc] sm:$0xf] }
   0x2   :  { %v80_v3 = vshrl.u32 %v57_v0, 16  ;;  %v83_v4 = vshll.u32 %v57_v0, 16  ;;  %v63_v5 = vshrl.u32 %v55_v1, 16  ;;  %v66_v6 = vshll.u32 %v55_v1, 16  ;;  %v56_v7 = vld [vmem:[%s2159_s0 + $0x4] sm:$0xf]  ;;  %vm61_vm4 = vmor %vm59_vm0, %vm60_vm1 }
   0x3   :  { %v88_v8 = vshrl.u32 %v58_v2, 16  ;;  %v91_v9 = vshll.u32 %v58_v2, 16  ;;  %v71_v10 = vshrl.u32 %v56_v7, 16  ;;  %v74_v11 = vshll.u32 %v56_v7, 16  ;;  %46 = vst.msk [vmem:[#allocation2 + $0xc] sm:$0xf] %vm41_vm2, %v1760_v16 }
   0x4   :  { %v82_v12 = vrot.slane %v80_v3, 7  ;;  %v65_v13 = vrot.slane %v63_v5, 7  ;;  %42 = vst.msk [vmem:[#allocation2] sm:$0xf] %vm41_vm2, %v1760_v16  ;;  %43 = vst.msk [vmem:[#allocation2 + $0x4] sm:$0xf] %vm41_vm2, %v1760_v16 }
   0x5   :  { %v90_v14 = vrot.slane %v88_v8, 7  ;;  %v73_v15 = vrot.slane %v71_v10, 7  ;;  %47 = vst.msk [vmem:[#allocation2 + $0x10] sm:$0xf] %vm41_vm2, %v1760_v16  ;;  %v1709_v17 = vld [vmem:[%s2160_s1 + $0x24] sm:$0xff]   ;;  %vm44_vm3 = vcmask 581632  }
   0x6   :  { %v85_v18 = vor.u32 %v83_v4, %v82_v12  ;;  %v86_v19 = vrot.slane %v82_v12, 4  ;;  %v68_v20 = vor.u32 %v66_v6, %v65_v13  ;;  %v69_v21 = vrot.slane %v65_v13, 4  ;;  %48 = vst.msk [vmem:[#allocation2 + $0x14] sm:$0x1] %vm44_vm3, %v1760_v16  ;;  %45 = vst.msk [vmem:[#allocation2 + $0x8] sm:$0x1] %vm44_vm3, %v1760_v16  ;;  %1534 = vmatprep.subr.bf16.mxu0 %v1709_v17 }
   0x7   :  { %v93_v22 = vor.u32 %v91_v9, %v90_v14  ;;  %v76_v23 = vor.u32 %v74_v11, %v73_v15  ;;  %v1710_v24 = vld [vmem:[%s2160_s1 + $0x2c] sm:$0xff]   ;;  %s1761_s14 = smov 4   ;;  %1535 = vmatpush3.bf16.msra.mxu0 %v1709_v17  ;;  %v1711_v27 = vld [vmem:[%s2160_s1 + $0x34] sm:$0xff]   ;;  %v95_v28 = vrot.slane %v90_v14, 4  ;;  %v78_v29 = vrot.slane %v73_v15, 4  ;;  %v1712_v30 = vld [vmem:[%s2160_s1 + $0x3c] sm:$0xff]  }
   0x8   :  { %102 = vrot.lane.b32.xlu1 %v85_v18, %s1761_s14  ;;  %96 = vrot.lane.b32.xlu0 %v68_v20, %s1761_s14  ;;  %v1713_v31 = vld [vmem:[%s2160_s1 + $0x44] ss:$0 sps:$4 sm:$0xff]   ;;  %vm250_vm5 = vcmask 1043456   ;;  %vm114_vm6 = vcmask 551968   ;;  %vm115_vm7 = vsmask.f32 7938 }
   0x9   :  { %v94_v25 = vsel %vm61_vm4, %v86_v19, %v93_v22  ;;  %v77_v26 = vsel %vm61_vm4, %v69_v21, %v76_v23  ;;  %1536 = vmatprep.subr.bf16.mxu0 %v1710_v24  ;;  %v252_v32 = vsel %vm250_vm5, %v1713_v31, 0  ;;  %v1876_v33 = vld [vmem:[%s2160_s1] sm:$0xff]   ;;  %vm116_vm8 = vmand %vm114_vm6, %vm115_vm7  ;;  %vm122_vm9 = vcmask 548896   ;;  %s1764_s21 = smov 120   ;;  %s1765_s18 = smov 8  }
   0xa   :  { %v127_v34 = vld [vmem:[#allocation2 + $0xc] sm:$0xf]  ;;  %vm123_vm10 = vmand %vm122_vm9, %vm59_vm0  ;;  %vm149_vm11 = vsmask.f32 3328  ;;  %vm150_vm12 = vsmask.f32 7440 }
   0xb   :  { %1537 = vmatpush3.bf16.msra.mxu0 %v1710_v24  ;;  %v117_v35 = vld [vmem:[#allocation2] sm:$0xf]  ;;  %vm1895_vm13 = vmor %vm149_vm11, %vm150_vm12  ;;  %vm243_vm14 = vcmask 588800   ;;  %vm404_vm15 = vcmask 1042432   ;;  %vm405_vm1 = vcmask 1046532   ;;  %vm1763_vm3 = vmmov 0  }
   0xc   :  { %104 = vrot.lane.b32.xlu1 %v94_v25, %s1761_s14  ;;  %98 = vrot.lane.b32.xlu0 %v77_v26, %s1761_s14  ;;  %v1716_v26 = vld [vmem:[%s2160_s1 + $0x8] sm:$0xff]   ;;  %vm1931_vm2 = vmor %vm404_vm15, %vm405_vm1  ;;  %vm550_vm4 = vcmask 261120   ;;  %vm799_vm9 = vcmask 584768   ;;  %vm804_vm11 = vcmask 581696   ;;  %v1749_v12 = vld [vmem:[%s2165_s6 + $0x60] sm:$0xff]  }
   0xd   :  { %1538 = vmatprep.subr.bf16.mxu0 %v1711_v27  ;;  %v131_v42 = vld [vmem:[#allocation2 + $0x14] sm:$0x1]  ;;  %v124_v43 = vld [vmem:[#allocation2 + $0x8] sm:$0x1]  ;;  %vm805_vm12 = vmand %vm804_vm11, %vm59_vm0  ;;  %vm1142_vm0 = vcmask 130048  }
   0xf   :  { %1539 = vmatpush3.bf16.msra.mxu0 %v1711_v27 }
  0x10   :  { %106 = vrot.lane.b32.xlu1 %v95_v28, %s1761_s14  ;;  %100 = vrot.lane.b32.xlu0 %v78_v29, %s1761_s14  ;;  %v1717_v28 = vld [vmem:[%s2160_s1 + $0x10] sm:$0xff]   ;;  %v1718_v29 = vld [vmem:[%s2160_s1 + $0x18] sm:$0xff]  }
  0x11   :  { %1540 = vmatprep.subr.bf16.mxu0 %v1712_v30 }
  0x13   :  { %1541 = vmatpush3.bf16.msra.mxu0 %v1712_v30  ;;  %v1719_v30 = vld [vmem:[%s2160_s1 + $0x20] ss:$0 sps:$4 sm:$0xff]  }
  0x14   :  { %1694 = vmatprep.subr.msk.bf16.mxu0 %vm250_vm5, %v1713_v31 }
  0x17   :  { %1543 = vmatpush3.bf16.msra.mxu0 %v252_v32 }
  0x18   :  { %1548 = vmatprep.subr.bf16.mxu0 %v1876_v33 }
  0x7a   :  { %v103_v36 = vpop.permute.xlu1 %102  ;;  %v97_v37 = vpop.permute.xlu0 %96 }
  0x7b   :  { %v128_v38 = vsel %vm116_vm8, %v103_v36, %v127_v34  ;;  %v118_v39 = vsel %vm116_vm8, %v97_v37, %v117_v35  ;;  %v347_v34 = vsel %vm250_vm5, %v1719_v30, 0  ;;  %v1721_v35 = vld [vmem:[%s2160_s1 + $0x48] sm:$0xff]   ;;  %vm768_vm8 = vcmask 519168  }
  0x7c   :  { %129 = vst [vmem:[#allocation2 + $0xc] sm:$0xf] %v128_v38  ;;  %119 = vst [vmem:[#allocation2] sm:$0xf] %v118_v39 }
  0x7e   :  { %v105_v40 = vpop.permute.xlu1 %104  ;;  %v99_v41 = vpop.permute.xlu0 %98 }
  0x7f   :  { %130 = vst.msk [vmem:[#allocation2 + $0x10] sm:$0xf] %vm114_vm6, %v105_v40  ;;  %121 = vst.msk [vmem:[#allocation2 + $0x4] sm:$0xf] %vm114_vm6, %v99_v41  ;;  %vm51_vm6 = vcmask 647168  }
  0x80   :  { %52 = vst.msk [vmem:[#allocation3 + $0x4] sm:$0x1] %vm51_vm6, %v1760_v16  ;;  %54 = vst.msk [vmem:[#allocation3 + $0xc] sm:$0x1] %vm51_vm6, %v1760_v16 }
  0x82   :  { %v107_v44 = vpop.permute.xlu1 %106  ;;  %v101_v45 = vpop.permute.xlu0 %100 }
  0x83   :  { %v132_v46 = vsel %vm123_vm10, %v107_v44, %v131_v42  ;;  %v125_v47 = vsel %vm123_vm10, %v101_v45, %v124_v43  ;;  %v134_v48 = vld [vmem:[#allocation2] sm:$0xf]  ;;  %v1881_v49 = vld [vmem:[#allocation2 + $0xc] sm:$0xf]  ;;  %v1722_v42 = vld [vmem:[%s2160_s1 + $0x50] sm:$0xff]  }
  0x84   :  { %133 = vst [vmem:[#allocation2 + $0x14] sm:$0x1] %v132_v46  ;;  %126 = vst [vmem:[#allocation2 + $0x8] sm:$0x1] %v125_v47  ;;  %v153_v50 = vshrl.u32 %v134_v48, 16  ;;  %v156_v51 = vshll.u32 %v134_v48, 16 }
  0x85   :  { %v177_v52 = vshrl.u32 %v1881_v49, 16  ;;  %v180_v53 = vshll.u32 %v1881_v49, 16  ;;  %v1723_v44 = vld [vmem:[%s2160_s1 + $0x58] sm:$0xff]   ;;  %v1724_v45 = vld [vmem:[%s2160_s1 + $0x60] sm:$0xff]   ;;  %v1725_v47 = vld [vmem:[%s2160_s1 + $0x68] ss:$0 sps:$4 sm:$0xff]  }
  0x86   :  { %v1885_v54 = vld [vmem:[#allocation2 + $0x4] sm:$0xf]  ;;  %v155_v55 = vrot.slane %v153_v50, 4  ;;  %v158_v56 = vrot.slane %v156_v51, 5  ;;  %v1887_v57 = vld [vmem:[#allocation2 + $0x10] sm:$0xf]  ;;  %vm800_vm10 = vmand %vm799_vm9, %vm115_vm7 }
  0x87   :  { %v162_v58 = vshll.u32 %v1885_v54, 16  ;;  %v166_v59 = vshrl.u32 %v1885_v54, 16  ;;  %v179_v60 = vrot.slane %v177_v52, 4  ;;  %v182_v61 = vrot.slane %v180_v53, 5 }
  0x88   :  { %v159_v62 = vor.u32 %v158_v56, %v155_v55  ;;  %v186_v63 = vshll.u32 %v1887_v57, 16  ;;  %v190_v0 = vshrl.u32 %v1887_v57, 16  ;;  %v1367_v27 = vcombine.low %v134_v48, %v1885_v54 }
  0x89   :  { %v164_v1 = vrot.slane %v162_v58, 5  ;;  %v168_v2 = vrot.slane %v166_v59, 4  ;;  %v183_v3 = vor.u32 %v182_v61, %v179_v60  ;;  %v409_v31 = vrot.slane %v1885_v54, 5 }
  0x8a   :  { %v188_v4 = vrot.slane %v186_v63, 5  ;;  %v192_v5 = vrot.slane %v190_v0, 4  ;;  %v160_v9 = vrot.slane %v159_v62, 4  ;;  %v1368_v40 = vcombine.low %v1881_v49, %v1887_v57  ;;  %v399_v49 = vld [vmem:[#allocation2 + $0xc] sm:$0xe] }
  0x8b   :  { %v147_v6 = vld [vmem:[#allocation2 + $0x8] sm:$0x1]  ;;  %v169_v7 = vor.u32 %v168_v2, %v164_v1  ;;  %v1893_v8 = vld [vmem:[#allocation2 + $0x14] sm:$0x1]  ;;  %v184_v14 = vrot.slane %v183_v3, 4  ;;  %v411_v36 = vrot.slane %v409_v31, 4 }
  0x8c   :  { %v172_v10 = vshll.u32 %v147_v6, 16  ;;  %v193_v11 = vor.u32 %v192_v5, %v188_v4  ;;  %v196_v15 = vshll.u32 %v1893_v8, 16  ;;  %v165_v20 = vsel %vm1895_vm13, %v160_v9, %v164_v1  ;;  %v1727_v9 = vld [vmem:[%s2162_s4] sm:$0xff]  }
  0x8d   :  { %v170_v13 = vrot.slane %v169_v7, 4  ;;  %v189_v23 = vsel %vm1895_vm13, %v184_v14, %v188_v4  ;;  %v412_v32 = vrot.slane %v147_v6, 5  ;;  %v416_v46 = vrot.slane %v1887_v57, 5  ;;  %v1396_v57 = vld [vmem:[%s2163_s2] ss:$0 sm:$0xff]  ;;  %v1731_v14 = vld [vmem:[%s2164_s5 + $0x18] sm:$0xff]  }
  0x8e   :  { %v174_v17 = vrot.slane %v172_v10, 5  ;;  %v194_v18 = vrot.slane %v193_v11, 4  ;;  %v198_v19 = vrot.slane %v196_v15, 5  ;;  %v419_v48 = vrot.slane %v1893_v8, 5  ;;  %v1726_v8 = vld [vmem:[%s2161_s3] sm:$0xff]   ;;  %v1729_v11 = vld [vmem:[%s2164_s5 + $0x8] sm:$0xff]  }
  0x8f   :  { %v413_v39 = vsel %vm1931_vm2, %v411_v36, %v412_v32  ;;  %v418_v50 = vrot.slane %v416_v46, 4  ;;  %v471_v51 = vsel %vm250_vm5, %v1725_v47, 0  ;;  %v1377_v52 = vrot.slane %v399_v49, 9  ;;  %v1728_v10 = vld [vmem:[%s2164_s5] sm:$0xff]   ;;  %v1741_v49 = vld [vmem:[%s2165_s6 + $0x18] sm:$0xff]   ;;  %s1766_s2 = smov 112  }
  0x90   :  { %v175_v21 = vsel %vm1895_vm13, %v170_v13, %v174_v17  ;;  %v199_v24 = vsel %vm1895_vm13, %v194_v18, %v198_v19  ;;  %v1762_v56 = vmov 0.0   ;;  %v1730_v13 = vld [vmem:[%s2164_s5 + $0x10] sm:$0xff]   ;;  %v1732_v15 = vld [vmem:[%s2164_s5 + $0x20] sm:$0xff]   ;;  %v1733_v17 = vld [vmem:[%s2164_s5 + $0x28] sm:$0xff]   ;;  %vm901_vm7 = vcmask 654336  }
  0x91   :  { %v1358_v22 = vcombine.low %v165_v20, %v175_v21  ;;  %v1359_v25 = vcombine.low %v189_v23, %v199_v24  ;;  %v420_v53 = vsel %vm1931_vm2, %v418_v50, %v419_v48  ;;  %v417_v54 = vsel %vm1931_vm2, %v1377_v52, %v416_v46  ;;  %1584 = vmatprep.subr.bf16.mxu1 %v1762_v56  ;;  %v1734_v18 = vld [vmem:[%s2164_s5 + $0x30] sm:$0xff]   ;;  %v1735_v19 = vld [vmem:[%s2164_s5 + $0x38] sm:$0xff]  }
  0x92   :  { %v1388_v55 = vcombine.low %v417_v54, %v420_v53  ;;  %1588 = vmatprep.mubr.msk.bf16.mxu1 %vm1763_vm3, %v1762_v56  ;;  %v1740_v48 = vld [vmem:[%s2165_s6 + $0x30] sm:$0xff]   ;;  %v1742_v53 = vld [vmem:[%s2165_s6 + $0x38] sm:$0xff]   ;;  %v1743_v54 = vld [vmem:[%s2165_s6 + $0x20] sm:$0xff]  }
  0x93   :  { %1544 = vmatprep.mubr.msk.bf16.mxu0 %vm243_vm14, %v1358_v22 }
  0x94   :  { %1545 = vmatmul.mubr.msk.bf16.vlgmr.msra.gmra.mrb[0].mxu0 %vm243_vm14, %v1359_v25 }
  0x95   :  { %1549 = vmatpush3.bf16.msra.mxu0 %v1876_v33  ;;  %1558 = vmatprep.mubr.msk.bf16.mxu0 %vm243_vm14, %v1367_v27  ;;  %v398_v33 = vld [vmem:[#allocation2] sm:$0xe] }
  0x96   :  { %1550 = vmatprep.subr.bf16.mxu0 %v1716_v26  ;;  %v1376_v38 = vrot.slane %v398_v33, 9 }
  0x98   :  { %v410_v41 = vsel %vm1931_vm2, %v1376_v38, %v409_v31  ;;  %v1736_v38 = vld [vmem:[%s2165_s6] sm:$0xff]  }
  0x99   :  { %1551 = vmatpush3.bf16.msra.mxu0 %v1716_v26  ;;  %v1387_v43 = vcombine.low %v410_v41, %v413_v39  ;;  %v1737_v39 = vld [vmem:[%s2165_s6 + $0x8] sm:$0xff]   ;;  %v1739_v41 = vld [vmem:[%s2165_s6 + $0x10] sm:$0xff]  }
  0x9a   :  { %1552 = vmatprep.subr.bf16.mxu0 %v1717_v28 }
  0x9d   :  { %1553 = vmatpush3.bf16.msra.mxu0 %v1717_v28 }
  0x9e   :  { %1554 = vmatprep.subr.bf16.mxu0 %v1718_v29 }
  0xa1   :  { %1555 = vmatpush3.bf16.msra.mxu0 %v1718_v29 }
  0xa2   :  { %1695 = vmatprep.subr.msk.bf16.mxu0 %vm250_vm5, %v1719_v30 }
  0xa5   :  { %1557 = vmatpush3.bf16.msra.mxu0 %v347_v34 }
  0xa6   :  { %1562 = vmatprep.subr.bf16.mxu0 %v1721_v35 }
  0xa8   :  { %1559 = vmatmul.mubr.msk.bf16.vlgmr.msra.gmra.mrb[0].mxu0 %vm243_vm14, %v1368_v40  ;;  %v1738_v40 = vld [vmem:[%s2165_s6 + $0x28] sm:$0xff]  }
  0xa9   :  { %1563 = vmatpush3.bf16.msra.mxu0 %v1721_v35  ;;  %1572 = vmatprep.mubr.msk.bf16.mxu0 %vm243_vm14, %v1387_v43 }
  0xaa   :  { %1564 = vmatprep.subr.bf16.mxu0 %v1722_v42 }
  0xad   :  { %1565 = vmatpush3.bf16.msra.mxu0 %v1722_v42 }
  0xae   :  { %1566 = vmatprep.subr.bf16.mxu0 %v1723_v44 }
  0xb1   :  { %1567 = vmatpush3.bf16.msra.mxu0 %v1723_v44 }
  0xb2   :  { %1568 = vmatprep.subr.bf16.mxu0 %v1724_v45 }
  0xb5   :  { %1569 = vmatpush3.bf16.msra.mxu0 %v1724_v45 }
  0xb6   :  { %1696 = vmatprep.subr.msk.bf16.mxu0 %vm250_vm5, %v1725_v47  ;;  %vm49_vm5 = vcmask 650240  }
  0xb7   :  { %50 = vst.msk [vmem:[#allocation3] sm:$0xf] %vm49_vm5, %v1760_v16  ;;  %53 = vst.msk [vmem:[#allocation3 + $0x8] sm:$0xf] %vm49_vm5, %v1760_v16 }
  0xb9   :  { %1571 = vmatpush3.bf16.msra.mxu0 %v471_v51 }
  0xba   :  { %1576 = vmatprep.subr.bf16.mxu0 %v1762_v56 }
  0xbc   :  { %1573 = vmatmul.mubr.msk.bf16.vlgmr.msra.gmra.mrb[0].mxu0 %vm243_vm14, %v1388_v55 }
  0xbd   :  { %1580 = vmatprep.mubr.msk.bf16.mxu0 %vm1763_vm3, %v1762_v56 }
 0x18f   :  { %v1574_v58 = vpop.f32.mrb[0].mxu0 }
 0x190   :  { %v535_v59 = vadd.f32 %v1574_v58, %v1396_v57  ;;  %v507_v60 = vpop.f32.mrb[1].mxu0 }
 0x191   :  { %v533_v61 = vadd.f32 %v1396_v57, %v507_v60  ;;  %v1575_v62 = vpop.f32.mrb[2].mxu0  ;;  %v1745_v60 = vld [vmem:[%s2165_s6 + $0x40] sm:$0xff]  }
 0x192   :  { %v536_v63 = vadd.f32 %v1575_v62, %v1396_v57  ;;  %v510_v0 = vpop.f32.mrb[3].mxu0  ;;  %v539_v2 = vmax.f32 %v535_v59, 0.0 }
 0x193   :  { %v534_v1 = vadd.f32 %v1396_v57, %v510_v0  ;;  %v537_v4 = vmax.f32 %v533_v61, 0.0  ;;  %v801_v0 = vld [vmem:[#allocation3] sm:$0xf] }
 0x194   :  { %v540_v3 = vmax.f32 %v536_v63, 0.0  ;;  %v1746_v63 = vld [vmem:[%s2165_s6 + $0x48] sm:$0xff]  }
 0x195   :  { %v538_v5 = vmax.f32 %v534_v1, 0.0 }
 0x196   :  { %v542_v6 = vpack.c.bf16 %v540_v3, %v539_v2  ;;  %v809_v2 = vld [vmem:[#allocation3 + $0x8] sm:$0xf] }
 0x197   :  { %v541_v7 = vpack.c.bf16 %v538_v5, %v537_v4  ;;  %v806_v5 = vld [vmem:[#allocation3 + $0x4] sm:$0x1] }
 0x199   :  { %1577 = vmatpush3.bf16.msra.mxu0 %v541_v7  ;;  %1585 = vmatpush3.bf16.msra.mxu1 %v541_v7 }
 0x19a   :  { %1578 = vmatprep.subr.bf16.mxu0 %v1762_v56  ;;  %1586 = vmatprep.subr.bf16.mxu1 %v1762_v56 }
 0x19d   :  { %1579 = vmatpush3.bf16.msra.mxu0 %v542_v6  ;;  %1587 = vmatpush3.bf16.msra.mxu1 %v542_v6 }
 0x19e   :  { %1592 = vmatprep.subr.bf16.mxu1 %v1762_v56  ;;  %1626 = vmatprep.subr.bf16.mxu0 %v1762_v56 }
 0x1a0   :  { %1581 = vmatmul.mubr.msk.bf16.vlgmr.msra.gmra.mrb[4].mxu0 %vm550_vm4, %v1726_v8  ;;  %1589 = vmatmul.mubr.msk.bf16.vlgmr.msra.gmra.mrb[0].mxu1 %vm550_vm4, %v1727_v9  ;;  %v812_v8 = vld [vmem:[#allocation3 + $0xc] sm:$0x1] }
 0x1a1   :  { %1608 = vmatprep.mubr.msk.bf16.mxu1 %vm1763_vm3, %v1762_v56  ;;  %1636 = vmatprep.mubr.msk.bf16.mxu0 %vm1763_vm3, %v1762_v56 }
 0x1a2   :  { %1593 = vmatpush3.bf16.msra.mxu1 %v1728_v10  ;;  %1627 = vmatpush3.bf16.msra.mxu0 %v1736_v38  ;;  %v1747_v38 = vld [vmem:[%s2165_s6 + $0x50] sm:$0xff]  }
 0x1a3   :  { %1594 = vmatprep.subr.bf16.mxu1 %v1762_v56  ;;  %1628 = vmatprep.subr.bf16.mxu0 %v1762_v56 }
 0x1a6   :  { %1595 = vmatpush3.bf16.msra.mxu1 %v1729_v11  ;;  %1629 = vmatpush3.bf16.msra.mxu0 %v1737_v39 }
 0x1a7   :  { %1596 = vmatprep.subr.bf16.mxu1 %v1762_v56  ;;  %1630 = vmatprep.subr.bf16.mxu0 %v1762_v56 }
 0x1aa   :  { %1597 = vmatpush3.bf16.msra.mxu1 %v1730_v13  ;;  %1631 = vmatpush3.bf16.msra.mxu0 %v1739_v41  ;;  %v1750_v41 = vld [vmem:[%s2165_s6 + $0x68] sm:$0xff]  }
 0x1ab   :  { %1598 = vmatprep.subr.bf16.mxu1 %v1762_v56  ;;  %1632 = vmatprep.subr.bf16.mxu0 %v1762_v56 }
 0x1ae   :  { %1599 = vmatpush3.bf16.msra.mxu1 %v1731_v14  ;;  %1633 = vmatpush3.bf16.msra.mxu0 %v1741_v49 }
 0x1af   :  { %1600 = vmatprep.subr.bf16.mxu1 %v1762_v56  ;;  %1634 = vmatprep.subr.bf16.mxu0 %v1762_v56 }
 0x1b2   :  { %1601 = vmatpush3.bf16.msra.mxu1 %v1732_v15  ;;  %1635 = vmatpush3.bf16.msra.mxu0 %v1743_v54 }
 0x1b3   :  { %1602 = vmatprep.subr.bf16.mxu1 %v1762_v56  ;;  %1654 = vmatprep.subr.bf16.mxu0 %v1762_v56 }
 0x1b6   :  { %1603 = vmatpush3.bf16.msra.mxu1 %v1733_v17 }
 0x1b7   :  { %1604 = vmatprep.subr.bf16.mxu1 %v1762_v56 }
 0x1ba   :  { %1605 = vmatpush3.bf16.msra.mxu1 %v1734_v18 }
 0x1bb   :  { %1606 = vmatprep.subr.bf16.mxu1 %v1762_v56 }
 0x1be   :  { %1607 = vmatpush3.bf16.msra.mxu1 %v1735_v19 }
 0x1bf   :  { %1612 = vmatprep.subr.bf16.mxu1 %v1762_v56 }
 0x273   :  { %v588_v20 = vpop.f32.mrb[4].mxu0  ;;  %v639_v21 = vpop.f32.mrb[0].mxu1 }
 0x274   :  { %v646_v22 = vmax.f32 %v588_v20, %v639_v21  ;;  %v1582_v23 = vpop.f32.mrb[5].mxu0  ;;  %v1590_v24 = vpop.f32.mrb[1].mxu1 }
 0x275   :  { %v591_v25 = vpop.f32.mrb[6].mxu0  ;;  %v642_v26 = vpop.f32.mrb[2].mxu1 }
 0x276   :  { %v647_v27 = vmax.f32 %v591_v25, %v642_v26  ;;  %v1583_v28 = vpop.f32.mrb[7].mxu0  ;;  %v1591_v29 = vpop.f32.mrb[3].mxu1 }
 0x278   :  { %v1704_v30 = vpack.i.bf16 %v647_v27, %v646_v22 }
 0x27a   :  { %1705 = vrot.lane.b32.xlu0 %v1704_v30, %s1764_s21 }
 0x2ec   :  { %v1706_v31 = vpop.permute.xlu0 %1705 }
 0x2ed   :  { %v1708_v32 = vunpack.i.h.bf16 %v1706_v31  ;;  %v1707_v33 = vunpack.i.l.bf16 %v1706_v31 }
 0x2ef   :  { %v653_v34 = vmax.f32 %v647_v27, %v1708_v32  ;;  %v652_v35 = vmax.f32 %v646_v22, %v1707_v33 }
 0x2f1   :  { %v654_v36 = vpack.c.bf16 %v653_v34, %v652_v35 }
 0x2f3   :  { %1609 = vmatmul.mubr.bf16.vlgmr.msra.gmra.mrb[4].mxu1 %v654_v36 }
 0x2f4   :  { %1622 = vmatprep.mubr.msk.bf16.mxu1 %vm1763_vm3, %v1762_v56  ;;  %1613 = vmatpush3.bf16.msra.mxu1 %v1738_v40  ;;  %v1748_v40 = vld [vmem:[%s2165_s6 + $0x58] sm:$0xff]  }
 0x2f5   :  { %1614 = vmatprep.subr.bf16.mxu1 %v1762_v56 }
 0x2f8   :  { %1615 = vmatpush3.bf16.msra.mxu1 %v1740_v48 }
 0x2f9   :  { %1616 = vmatprep.subr.bf16.mxu1 %v1762_v56 }
 0x2fc   :  { %1617 = vmatpush3.bf16.msra.mxu1 %v1742_v53 }
 0x2fd   :  { %1618 = vmatprep.subr.bf16.mxu1 %v1762_v56 }
 0x300   :  { %1619 = vmatpush3.bf16.msra.mxu1 %v1745_v60 }
 0x301   :  { %1620 = vmatprep.subr.bf16.mxu1 %v1762_v56 }
 0x304   :  { %1621 = vmatpush3.bf16.msra.mxu1 %v1746_v63 }
 0x305   :  { %1640 = vmatprep.subr.bf16.mxu1 %v1762_v56 }
 0x3c6   :  { %v753_v42 = vpop.f32.mrb[4].mxu1 }
 0x3c7   :  { %v1465_v43 = vpack.c.bf16 %v753_v42, %v753_v42  ;;  %v1610_v44 = vpop.f32.mrb[5].mxu1 }
 0x3c8   :  { %v756_v45 = vpop.f32.mrb[6].mxu1 }
 0x3c9   :  { %769 = vst.msk [vmem:[%s2166_s11] sm:$0xf] %vm768_vm8, %v1465_v43  ;;  %v772_v16 = vshrl.u32 %v1465_v43, 16  ;;  %v1466_v46 = vpack.c.bf16 %v756_v45, %v756_v45  ;;  %v1611_v47 = vpop.f32.mrb[7].mxu1  ;;  %v775_v51 = vshll.u32 %v1465_v43, 16  ;;  %v1751_v45 = vld [vmem:[%s2165_s6 + $0x70] sm:$0xff]  }
 0x3cb   :  { %v774_v50 = vrot.slane %v772_v16, 7  ;;  %770 = vst.msk [vmem:[%s2166_s11 + $0x4] sm:$0xf] %vm768_vm8, %v1466_v46  ;;  %v780_v52 = vshrl.u32 %v1466_v46, 16  ;;  %v783_v57 = vshll.u32 %v1466_v46, 16 }
 0x3cd   :  { %v782_v55 = vrot.slane %v780_v52, 7  ;;  %v777_v58 = vor.u32 %v775_v51, %v774_v50  ;;  %v778_v61 = vrot.slane %v774_v50, 4 }
 0x3cf   :  { %787 = vrot.lane.b32.xlu1 %v777_v58, %s1765_s18  ;;  %v785_v59 = vor.u32 %v783_v57, %v782_v55  ;;  %v786_v62 = vrot.slane %v782_v55, 4 }
 0x3d1   :  { %791 = vrot.lane.b32.xlu0 %v785_v59, %s1765_s18 }
 0x3d3   :  { %789 = vrot.lane.b32.xlu1 %v778_v61, %s1765_s18 }
 0x3d5   :  { %793 = vrot.lane.b32.xlu0 %v786_v62, %s1765_s18  ;;  %v1454_v62 = vld [vmem:[%s2167_s7] ss:$0 sm:$0xff] }
 0x441   :  { %v788_v1 = vpop.permute.xlu1 %787 }
 0x442   :  { %v802_v3 = vsel %vm800_vm10, %v788_v1, %v801_v0 }
 0x443   :  { %803 = vst [vmem:[#allocation3] sm:$0xf] %v802_v3  ;;  %v792_v4 = vpop.permute.xlu0 %791 }
 0x444   :  { %v810_v6 = vsel %vm800_vm10, %v792_v4, %v809_v2 }
 0x445   :  { %811 = vst [vmem:[#allocation3 + $0x8] sm:$0xf] %v810_v6  ;;  %v790_v7 = vpop.permute.xlu1 %789 }
 0x446   :  { %v807_v9 = vsel %vm805_vm12, %v790_v7, %v806_v5 }
 0x447   :  { %808 = vst [vmem:[#allocation3 + $0x4] sm:$0x1] %v807_v9  ;;  %v794_v10 = vpop.permute.xlu0 %793  ;;  %v1141_v9 = vld [vmem:[%s2168_s8] sm:$0xf] }
 0x448   :  { %v813_v11 = vsel %vm805_vm12, %v794_v10, %v812_v8  ;;  %v1186_v10 = vld [vmem:[%s2169_s9] sm:$0xf] }
 0x449   :  { %814 = vst [vmem:[#allocation3 + $0xc] sm:$0x1] %v813_v11  ;;  %v1752_v11 = vld [vmem:[%s2170_s10] sm:$0xff]  }
 0x44a   :  { %v815_v13 = vld [vmem:[#allocation3] sm:$0xf] }
 0x44b   :  { %v830_v14 = vshrl.u32 %v815_v13, 16  ;;  %v833_v15 = vshll.u32 %v815_v13, 16  ;;  %v1025_v44 = vld [vmem:[#allocation3] sm:$0xe] }
 0x44c   :  { %v816_v17 = vld [vmem:[#allocation3 + $0x8] sm:$0xf]  ;;  %v1435_v47 = vrot.slane %v1025_v44, 9 }
 0x44d   :  { %v832_v18 = vrot.slane %v830_v14, 4  ;;  %v835_v19 = vrot.slane %v833_v15, 5  ;;  %v844_v20 = vshrl.u32 %v816_v17, 16  ;;  %v847_v21 = vshll.u32 %v816_v17, 16  ;;  %v1026_v42 = vld [vmem:[#allocation3 + $0x8] sm:$0xe] }
 0x44e   :  { %v1428_v22 = vcombine.low %v815_v13, %v816_v17  ;;  %v827_v23 = vld [vmem:[#allocation3 + $0x4] sm:$0x1]  ;;  %v1436_v46 = vrot.slane %v1026_v42, 9  ;;  %v1753_v13 = vld [vmem:[%s2170_s10 + $0x8] sm:$0xff]   ;;  %v1754_v14 = vld [vmem:[%s2170_s10 + $0x10] sm:$0xff]  }
 0x44f   :  { %v846_v24 = vrot.slane %v844_v20, 4  ;;  %v849_v25 = vrot.slane %v847_v21, 5  ;;  %v836_v26 = vor.u32 %v835_v19, %v832_v18  ;;  %v839_v27 = vshll.u32 %v827_v23, 16  ;;  %v1755_v15 = vld [vmem:[%s2170_s10 + $0x18] sm:$0xff]   ;;  %v1756_v17 = vld [vmem:[%s2170_s10 + $0x20] sm:$0xff]   ;;  %v1757_v18 = vld [vmem:[%s2170_s10 + $0x28] sm:$0xff]  }
 0x450   :  { %1637 = vmatmul.mubr.msk.bf16.vlgmr.msra.gmra.mrb[8].mxu0 %vm901_vm7, %v1428_v22  ;;  %v828_v28 = vld [vmem:[#allocation3 + $0xc] sm:$0x1]  ;;  %v1033_v16 = vrot.slane %v827_v23, 5  ;;  %v1758_v19 = vld [vmem:[%s2170_s10 + $0x30] sm:$0xff]   ;;  %v1759_v21 = vld [vmem:[%s2170_s10 + $0x38] sm:$0xff]  }
 0x451   :  { %v837_v29 = vrot.slane %v836_v26, 4  ;;  %v841_v30 = vrot.slane %v839_v27, 5  ;;  %v850_v31 = vor.u32 %v849_v25, %v846_v24  ;;  %v853_v32 = vshll.u32 %v828_v28, 16  ;;  %1656 = vmatprep.mubr.msk.bf16.mxu0 %vm1763_vm3, %v1762_v56 }
 0x452   :  { %v1037_v43 = vrot.slane %v828_v28, 5  ;;  %v1034_v49 = vsel %vm1931_vm2, %v1435_v47, %v1033_v16 }
 0x453   :  { %v851_v33 = vrot.slane %v850_v31, 4  ;;  %v855_v34 = vrot.slane %v853_v32, 5  ;;  %v842_v35 = vsel %vm1895_vm13, %v837_v29, %v841_v30 }
 0x454   :  { %v1038_v48 = vsel %vm1931_vm2, %v1436_v46, %v1037_v43 }
 0x455   :  { %v856_v36 = vsel %vm1895_vm13, %v851_v33, %v855_v34  ;;  %v1447_v50 = vcombine.low %v1034_v49, %v1038_v48 }
 0x456   :  { %v1421_v39 = vcombine.low %v842_v35, %v856_v36 }
 0x458   :  { %1623 = vmatmul.mubr.msk.bf16.vlgmr.msra.gmra.mrb[8].mxu1 %vm901_vm7, %v1421_v39 }
 0x459   :  { %1641 = vmatpush3.bf16.msra.mxu1 %v1747_v38  ;;  %1650 = vmatprep.mubr.msk.bf16.mxu1 %vm1763_vm3, %v1762_v56 }
 0x45a   :  { %1642 = vmatprep.subr.bf16.mxu1 %v1762_v56 }
 0x45d   :  { %1643 = vmatpush3.bf16.msra.mxu1 %v1748_v40 }
 0x45e   :  { %1644 = vmatprep.subr.bf16.mxu1 %v1762_v56 }
 0x461   :  { %1645 = vmatpush3.bf16.msra.mxu1 %v1749_v12 }
 0x462   :  { %1646 = vmatprep.subr.bf16.mxu1 %v1762_v56 }
 0x465   :  { %1647 = vmatpush3.bf16.msra.mxu1 %v1750_v41 }
 0x466   :  { %1648 = vmatprep.subr.bf16.mxu1 %v1762_v56 }
 0x469   :  { %1649 = vmatpush3.bf16.msra.mxu1 %v1751_v45 }
 0x46a   :  { %1666 = vmatprep.subr.bf16.mxu1 %v1762_v56 }
 0x46c   :  { %1651 = vmatmul.mubr.msk.bf16.vlgmr.msra.gmra.mrb[12].mxu1 %vm901_vm7, %v1447_v50 }
 0x46d   :  { %1682 = vmatprep.mubr.msk.bf16.mxu1 %vm1763_vm3, %v1762_v56  ;;  %1667 = vmatpush3.bf16.msra.mxu1 %v1752_v11 }
 0x46e   :  { %1668 = vmatprep.subr.bf16.mxu1 %v1762_v56 }
 0x471   :  { %1669 = vmatpush3.bf16.msra.mxu1 %v1753_v13 }
 0x472   :  { %1670 = vmatprep.subr.bf16.mxu1 %v1762_v56 }
 0x475   :  { %1671 = vmatpush3.bf16.msra.mxu1 %v1754_v14 }
 0x476   :  { %1672 = vmatprep.subr.bf16.mxu1 %v1762_v56 }
 0x479   :  { %1673 = vmatpush3.bf16.msra.mxu1 %v1755_v15 }
 0x47a   :  { %1674 = vmatprep.subr.bf16.mxu1 %v1762_v56 }
 0x47d   :  { %1675 = vmatpush3.bf16.msra.mxu1 %v1756_v17 }
 0x47e   :  { %1676 = vmatprep.subr.bf16.mxu1 %v1762_v56 }
 0x481   :  { %1677 = vmatpush3.bf16.msra.mxu1 %v1757_v18 }
 0x482   :  { %1678 = vmatprep.subr.bf16.mxu1 %v1762_v56 }
 0x485   :  { %1679 = vmatpush3.bf16.msra.mxu1 %v1758_v19 }
 0x486   :  { %1680 = vmatprep.subr.bf16.mxu1 %v1762_v56 }
 0x489   :  { %1681 = vmatpush3.bf16.msra.mxu1 %v1759_v21 }
 0x523   :  { %v1018_v51 = vpop.f32.mrb[8].mxu0 }
 0x524   :  { %v1638_v52 = vpop.f32.mrb[9].mxu0 }
 0x525   :  { %v1021_v53 = vpop.f32.mrb[10].mxu0 }
 0x526   :  { %v1639_v54 = vpop.f32.mrb[11].mxu0 }
 0x52b   :  { %v939_v55 = vpop.f32.mrb[8].mxu1 }
 0x52c   :  { %v1019_v57 = vadd.f32 %v1018_v51, %v939_v55  ;;  %v1624_v58 = vpop.f32.mrb[9].mxu1 }
 0x52d   :  { %v942_v59 = vpop.f32.mrb[10].mxu1 }
 0x52e   :  { %v1022_v60 = vadd.f32 %v1021_v53, %v942_v59  ;;  %v1625_v61 = vpop.f32.mrb[11].mxu1 }
 0x53f   :  { %v1120_v37 = vpop.f32.mrb[12].mxu1 }
 0x540   :  { %v1127_v63 = vadd.f32 %v1120_v37, %v1019_v57  ;;  %v1652_v0 = vpop.f32.mrb[13].mxu1 }
 0x541   :  { %v1123_v1 = vpop.f32.mrb[14].mxu1 }
 0x542   :  { %v1136_v2 = vadd.f32 %v1454_v62, %v1127_v63  ;;  %v1128_v3 = vadd.f32 %v1123_v1, %v1022_v60  ;;  %v1653_v4 = vpop.f32.mrb[15].mxu1 }
 0x544   :  { %v1137_v5 = vadd.f32 %v1454_v62, %v1128_v3  ;;  %v1138_v6 = vmax.f32 %v1136_v2, 0.0 }
 0x546   :  { %v1139_v7 = vmax.f32 %v1137_v5, 0.0 }
 0x548   :  { %v1140_v8 = vpack.c.bf16 %v1139_v7, %v1138_v6 }
 0x54a   :  { %1655 = vmatpush3.bf16.msra.mxu0 %v1140_v8 }
 0x54b   :  { %1660 = vmatprep.subr.bf16.mxu0 %v1762_v56 }
 0x54d   :  { %1657 = vmatmul.mubr.msk.bf16.vlgmr.msra.gmra.mrb[12].mxu0 %vm1142_vm0, %v1141_v9 }
 0x54e   :  { %1661 = vmatpush3.bf16.msra.mxu0 %v1140_v8  ;;  %1662 = vmatprep.mubr.msk.bf16.mxu0 %vm1763_vm3, %v1762_v56 }
 0x555   :  { %1663 = vmatmul.mubr.msk.bf16.vlgmr.msra.gmra.mrb[16].mxu0 %vm1142_vm0, %v1186_v10 }
 0x620   :  { %v1180_v20 = vpop.f32.mrb[12].mxu0 }
 0x621   :  { %v1658_v22 = vpop.f32.mrb[13].mxu0 }
 0x622   :  { %v1183_v23 = vpop.f32.mrb[14].mxu0 }
 0x623   :  { %v1659_v24 = vpop.f32.mrb[15].mxu0 }
 0x628   :  { %v1224_v25 = vpop.f32.mrb[16].mxu0 }
 0x629   :  { %v1230_v26 = vmax.f32 %v1180_v20, %v1224_v25  ;;  %v1664_v27 = vpop.f32.mrb[17].mxu0 }
 0x62a   :  { %v1227_v28 = vpop.f32.mrb[18].mxu0 }
 0x62b   :  { %1231 = vrot.lane.b32.xlu1 %v1230_v26, %s1766_s2  ;;  %v1665_v29 = vpop.f32.mrb[19].mxu0 }
 0x69d   :  { %v1232_v30 = vpop.permute.xlu1 %1231 }
 0x69e   :  { %v1233_v31 = vmax.f32 %v1230_v26, %v1232_v30 }
 0x6a0   :  { %v1234_v32 = vpack.c.bf16 %v1233_v31, %v1233_v31 }
 0x6a2   :  { %1683 = vmatmul.mubr.bf16.vlgmr.msra.gmra.mrb[16].mxu1 %v1234_v32 }
 0x775   :  { %v1333_v56 = vpop.f32.mrb[16].mxu1 }
 0x776   :  { %v1339_v33 = vpack.c.bf16 %v1333_v56, %v1333_v56  ;;  %v1684_v34 = vpop.f32.mrb[17].mxu1 }
 0x777   :  { %v1336_v35 = vpop.f32.mrb[18].mxu1 }
 0x778   :  { %1340 = vst.msk [vmem:[%s2171_s12] sm:$0xf] %vm768_vm8, %v1339_v33  ;;  %v1685_v36 = vpop.f32.mrb[19].mxu1 }

// kernel: mime_vgg_forward.3
= control target key start
LH: loop header
LB: loop body
LE: loop exit
PB: predicated region body
PF: predicated region fallthrough
CT: control target
= control target key end

     0   :  { %v2311_v22 = vmov 1966171168   ;;  %v179_v24 = vlaneseq  ;;  %vm2313_vm0 = vmmov 0   ;;  %vm1517_vm1 = vcmask 1041408   ;;  %s2995_s5 = inlined_call_operand.vmem [shape: bf16[1024,128], index: 5, kind: input, shape index: {}]   ;;  %s2996_s0 = inlined_call_operand.vmem [shape: bf16[2,1024], index: 0, kind: input, shape index: {}]   ;;  %s2997_s7 = inlined_call_operand.vmem [shape: bf16[256,128], index: 7, kind: input, shape index: {}]   ;;  %s2998_s6 = inlined_call_operand.vmem [shape: bf16[512,128], index: 6, kind: input, shape index: {}]   ;;  %s2999_s3 = inlined_call_operand.vmem [shape: bf16[2,256], index: 3, kind: input, shape index: {}]   ;;  %s3000_s1 = inlined_call_operand.vmem [shape: bf16[2,512], index: 1, kind: input, shape index: {}]   ;;  %s3001_s4 = inlined_call_operand.vmem [shape: bf16[2,256], index: 4, kind: input, shape index: {}]   ;;  %s3002_s2 = inlined_call_operand.vmem [shape: bf16[2,512], index: 2, kind: input, shape index: {}]   ;;  %s3003_s9 = inlined_call_operand.vmem [shape: bf16[128,128], index: 9, kind: input, shape index: {}]   ;;  %s3004_s11 = inlined_call_operand.vmem [shape: bf16[128,2], index: 11, kind: input, shape index: {}]   ;;  %s3005_s8 = inlined_call_operand.vmem [shape: f32[1,128], index: 8, kind: input, shape index: {}]   ;;  %s3006_s10 = inlined_call_operand.vmem [shape: f32[1,128], index: 10, kind: input, shape index: {}]   ;;  %s3007_s12 = inlined_call_operand.vmem [shape: f32[1,2], index: 12, kind: input, shape index: {}]   ;;  %s3008_s13 = inlined_call_operand.vmem [shape: f32[2,4], index: 13, kind: output, shape index: {}]  }
   0x1   :  { %v2182_v0 = vld [vmem:[%s2995_s5 + $0x40] sm:$0xff]   ;;  %v2186_v4 = vld [vmem:[%s2995_s5 + $0x48] sm:$0xff]   ;;  %v2190_v8 = vld [vmem:[%s2995_s5 + $0x50] sm:$0xff]   ;;  %v177_v23 = vunpack.c.l.s4 %v2311_v22  ;;  %vm1753_vm2 = vcmask 9216   ;;  %vm1759_vm3 = vcmask 27666  }
   0x2   :  { %v2183_v1 = vld [vmem:[%s2995_s5 + $0xc0] sm:$0xff]   ;;  %1900 = vmatprep.subr.bf16.mxu0 %v2182_v0  ;;  %v2187_v5 = vld [vmem:[%s2995_s5 + $0xc8] sm:$0xff]   ;;  %v2191_v9 = vld [vmem:[%s2995_s5 + $0xd0] sm:$0xff]   ;;  %v180_v30 = vshrl.u32 %v179_v24, 7 }
   0x3   :  { %v2184_v2 = vld [vmem:[%s2995_s5] sm:$0xff]   ;;  %1922 = vmatprep.subr.bf16.mxu1 %v2183_v1  ;;  %v2188_v6 = vld [vmem:[%s2995_s5 + $0x8] sm:$0xff]   ;;  %v2192_v10 = vld [vmem:[%s2995_s5 + $0x10] sm:$0xff]   ;;  %v178_v29 = vunpack.c.0.s8 %v177_v23 }
   0x4   :  { %v2185_v3 = vld [vmem:[%s2995_s5 + $0x80] sm:$0xff]   ;;  %1901 = vmatpush3.bf16.msra.mxu0 %v2184_v2  ;;  %v2189_v7 = vld [vmem:[%s2995_s5 + $0x88] sm:$0xff]   ;;  %v2193_v11 = vld [vmem:[%s2995_s5 + $0x90] sm:$0xff]  }
   0x5   :  { %1923 = vmatpush3.bf16.msra.mxu1 %v2185_v3  ;;  %1902 = vmatprep.subr.bf16.mxu0 %v2186_v4  ;;  %v2194_v12 = vld [vmem:[%s2995_s5 + $0x58] sm:$0xff]   ;;  %v2198_v16 = vld [vmem:[%s2995_s5 + $0x60] sm:$0xff]   ;;  %v2202_v20 = vld [vmem:[%s2995_s5 + $0x68] sm:$0xff]   ;;  %v2475_v35 = vsub.s32 %v178_v29, %v180_v30 }
   0x6   :  { %1924 = vmatprep.subr.bf16.mxu1 %v2187_v5  ;;  %v2195_v13 = vld [vmem:[%s2995_s5 + $0xd8] sm:$0xff]   ;;  %v2199_v17 = vld [vmem:[%s2995_s5 + $0xe0] sm:$0xff]   ;;  %v2203_v21 = vld [vmem:[%s2995_s5 + $0xe8] sm:$0xff]  }
   0x7   :  { %v2196_v14 = vld [vmem:[%s2995_s5 + $0x18] sm:$0xff]   ;;  %v2200_v18 = vld [vmem:[%s2995_s5 + $0x20] sm:$0xff]   ;;  %v2204_v25 = vld [vmem:[%s2995_s5 + $0x28] sm:$0xff]  }
   0x8   :  { %1903 = vmatpush3.bf16.msra.mxu0 %v2188_v6  ;;  %v2197_v15 = vld [vmem:[%s2995_s5 + $0x98] sm:$0xff]   ;;  %v2201_v19 = vld [vmem:[%s2995_s5 + $0xa0] sm:$0xff]   ;;  %v2205_v26 = vld [vmem:[%s2995_s5 + $0xa8] sm:$0xff]  }
   0x9   :  { %1925 = vmatpush3.bf16.msra.mxu1 %v2189_v7  ;;  %1904 = vmatprep.subr.bf16.mxu0 %v2190_v8  ;;  %v2206_v27 = vld [vmem:[%s2995_s5 + $0x70] sm:$0xff]   ;;  %v2210_v33 = vld [vmem:[%s2995_s5 + $0x78] sm:$0xff]   ;;  %v45_v38 = vld [vmem:[%s2996_s0] sm:$0xff] }
   0xa   :  { %1926 = vmatprep.subr.bf16.mxu1 %v2191_v9  ;;  %v2207_v28 = vld [vmem:[%s2995_s5 + $0xf0] sm:$0xff]   ;;  %v2211_v34 = vld [vmem:[%s2995_s5 + $0xf8] sm:$0xff]   ;;  %v175_v39 = vcombine.high %v45_v38, %v45_v38  ;;  %v182_v40 = vrot.slane %v45_v38, %v2475_v35  ;;  %v2215_v41 = vld [vmem:[%s2995_s5 + $0x140] sm:$0xff]  }
   0xb   :  { %v2208_v31 = vld [vmem:[%s2995_s5 + $0x30] sm:$0xff]   ;;  %v2212_v36 = vld [vmem:[%s2995_s5 + $0x38] sm:$0xff]   ;;  %v2216_v42 = vld [vmem:[%s2995_s5 + $0x1c0] sm:$0xff]  }
   0xc   :  { %1905 = vmatpush3.bf16.msra.mxu0 %v2192_v10  ;;  %v2209_v32 = vld [vmem:[%s2995_s5 + $0xb0] sm:$0xff]   ;;  %v2213_v37 = vld [vmem:[%s2995_s5 + $0xb8] sm:$0xff]   ;;  %v190_v43 = vcombine.high %v182_v40, %v182_v40  ;;  %v198_v44 = vrot.slane %v182_v40, %v2475_v35  ;;  %v2495_v45 = vrot.slane %v175_v39, %v2475_v35  ;;  %v2217_v46 = vld [vmem:[%s2995_s5 + $0x100] sm:$0xff]  }
   0xd   :  { %1927 = vmatpush3.bf16.msra.mxu1 %v2193_v11  ;;  %1906 = vmatprep.subr.bf16.mxu0 %v2194_v12  ;;  %v2218_v48 = vld [vmem:[%s2995_s5 + $0x180] sm:$0xff]   ;;  %v2219_v51 = vld [vmem:[%s2995_s5 + $0x148] sm:$0xff]   ;;  %v2223_v58 = vld [vmem:[%s2995_s5 + $0x150] sm:$0xff]  }
   0xe   :  { %1928 = vmatprep.subr.bf16.mxu1 %v2195_v13  ;;  %v212_v47 = vrot.slane %v190_v43, %v2475_v35  ;;  %v191_v49 = vcombine.high %v2495_v45, %v2495_v45  ;;  %v220_v50 = vcombine.high %v198_v44, %v198_v44  ;;  %v2220_v53 = vld [vmem:[%s2995_s5 + $0x1c8] sm:$0xff]   ;;  %v2224_v59 = vld [vmem:[%s2995_s5 + $0x1d0] sm:$0xff]   ;;  %v2227_v62 = vld [vmem:[%s2995_s5 + $0x158] sm:$0xff]  }
   0xf   :  { %v2221_v55 = vld [vmem:[%s2995_s5 + $0x108] sm:$0xff]   ;;  %v2225_v60 = vld [vmem:[%s2995_s5 + $0x110] sm:$0xff]   ;;  %v2228_v63 = vld [vmem:[%s2995_s5 + $0x1d8] sm:$0xff]  }
  0x10   :  { %1907 = vmatpush3.bf16.msra.mxu0 %v2196_v14  ;;  %648 = vmatprep.mubr.bf16.mxu0 %v212_v47  ;;  %v222_v52 = vcombine.high %v212_v47, %v212_v47  ;;  %v219_v54 = vrot.slane %v191_v49, %v2475_v35  ;;  %v2222_v56 = vld [vmem:[%s2995_s5 + $0x188] sm:$0xff]   ;;  %v2226_v61 = vld [vmem:[%s2995_s5 + $0x190] sm:$0xff]   ;;  %v2229_v0 = vld [vmem:[%s2995_s5 + $0x118] sm:$0xff]  }
  0x11   :  { %1929 = vmatpush3.bf16.msra.mxu1 %v2197_v15  ;;  %1908 = vmatprep.subr.bf16.mxu0 %v2198_v16  ;;  %v2230_v1 = vld [vmem:[%s2995_s5 + $0x198] sm:$0xff]   ;;  %v2231_v2 = vld [vmem:[%s2995_s5 + $0x160] sm:$0xff]   ;;  %v2235_v6 = vld [vmem:[%s2995_s5 + $0x168] sm:$0xff]  }
  0x12   :  { %1930 = vmatprep.subr.bf16.mxu1 %v2199_v17  ;;  %688 = vmatprep.mubr.bf16.mxu1 %v222_v52  ;;  %v223_v57 = vcombine.high %v219_v54, %v219_v54  ;;  %v2232_v3 = vld [vmem:[%s2995_s5 + $0x1e0] sm:$0xff]   ;;  %v2236_v7 = vld [vmem:[%s2995_s5 + $0x1e8] sm:$0xff]   ;;  %v2239_v10 = vld [vmem:[%s2995_s5 + $0x170] sm:$0xff]  }
  0x13   :  { %v2233_v4 = vld [vmem:[%s2995_s5 + $0x120] sm:$0xff]   ;;  %v2237_v8 = vld [vmem:[%s2995_s5 + $0x128] sm:$0xff]   ;;  %v2240_v11 = vld [vmem:[%s2995_s5 + $0x1f0] sm:$0xff]  }
  0x14   :  { %1909 = vmatpush3.bf16.msra.mxu0 %v2200_v18  ;;  %v2234_v5 = vld [vmem:[%s2995_s5 + $0x1a0] sm:$0xff]   ;;  %v2238_v9 = vld [vmem:[%s2995_s5 + $0x1a8] sm:$0xff]   ;;  %v2241_v12 = vld [vmem:[%s2995_s5 + $0x130] sm:$0xff]   ;;  %v205_v18 = vrot.slane %v2495_v45, %v2475_v35 }
  0x15   :  { %1931 = vmatpush3.bf16.msra.mxu1 %v2201_v19  ;;  %1910 = vmatprep.subr.bf16.mxu0 %v2202_v20  ;;  %v2242_v13 = vld [vmem:[%s2995_s5 + $0x1b0] sm:$0xff]   ;;  %v2243_v14 = vld [vmem:[%s2995_s5 + $0x178] sm:$0xff]   ;;  %v2596_v19 = vld [vmem:[%s2997_s7 + $0x40] sm:$0xff]  }
  0x16   :  { %1932 = vmatprep.subr.bf16.mxu1 %v2203_v21  ;;  %v2244_v15 = vld [vmem:[%s2995_s5 + $0x1f8] sm:$0xff]   ;;  %v2601_v20 = vld [vmem:[%s2998_s6 + $0x40] sm:$0xff]   ;;  %v221_v23 = vcombine.high %v205_v18, %v205_v18  ;;  %v2617_v24 = vld [vmem:[%s2997_s7 + $0x48] sm:$0xff]  }
  0x17   :  { %v2245_v16 = vld [vmem:[%s2995_s5 + $0x138] sm:$0xff]   ;;  %v2606_v21 = vld [vmem:[%s2997_s7] sm:$0xff]   ;;  %v2646_v29 = vld [vmem:[%s2998_s6 + $0x50] sm:$0xff]  }
  0x18   :  { %1911 = vmatpush3.bf16.msra.mxu0 %v2204_v25  ;;  %v2246_v17 = vld [vmem:[%s2995_s5 + $0x1b8] sm:$0xff]   ;;  %v2611_v22 = vld [vmem:[%s2998_s6] sm:$0xff]   ;;  %v2622_v25 = vld [vmem:[%s2998_s6 + $0x48] sm:$0xff]  }
  0x19   :  { %1933 = vmatpush3.bf16.msra.mxu1 %v2205_v26  ;;  %1912 = vmatprep.subr.bf16.mxu0 %v2206_v27  ;;  %v2628_v26 = vld [vmem:[%s2997_s7 + $0x8] sm:$0xff]   ;;  %v2652_v30 = vld [vmem:[%s2997_s7 + $0x10] sm:$0xff]   ;;  %v2694_v38 = vld [vmem:[%s2998_s6 + $0x60] sm:$0xff]  }
  0x1a   :  { %1934 = vmatprep.subr.bf16.mxu1 %v2207_v28  ;;  %v2634_v27 = vld [vmem:[%s2998_s6 + $0x8] sm:$0xff]   ;;  %v2640_v28 = vld [vmem:[%s2997_s7 + $0x50] sm:$0xff]   ;;  %v2700_v39 = vld [vmem:[%s2997_s7 + $0x20] sm:$0xff]  }
  0x1b   :  { %v2706_v40 = vld [vmem:[%s2998_s6 + $0x20] sm:$0xff]   ;;  %v2724_v43 = vld [vmem:[%s2997_s7 + $0x28] sm:$0xff]   ;;  %v2736_v45 = vld [vmem:[%s2997_s7 + $0x70] sm:$0xff]  }
  0x1c   :  { %1913 = vmatpush3.bf16.msra.mxu0 %v2208_v31  ;;  %v2658_v31 = vld [vmem:[%s2998_s6 + $0x10] sm:$0xff]   ;;  %v2760_v49 = vld [vmem:[%s2997_s7 + $0x78] sm:$0xff]   ;;  %v1829_v52 = vld.sshfl [vmem:[%s2999_s3] sm:$0x11 pattern:$0x75316420] }
  0x1d   :  { %1935 = vmatpush3.bf16.msra.mxu1 %v2209_v32  ;;  %1914 = vmatprep.subr.bf16.mxu0 %v2210_v33  ;;  %v2664_v32 = vld [vmem:[%s2997_s7 + $0x58] sm:$0xff]   ;;  %v2748_v47 = vld [vmem:[%s2997_s7 + $0x30] sm:$0xff]  }
  0x1e   :  { %1936 = vmatprep.subr.bf16.mxu1 %v2211_v34  ;;  %v2670_v33 = vld [vmem:[%s2998_s6 + $0x58] sm:$0xff]  }
  0x1f   :  { %v2676_v34 = vld [vmem:[%s2997_s7 + $0x18] sm:$0xff]  }
  0x20   :  { %1915 = vmatpush3.bf16.msra.mxu0 %v2212_v36  ;;  %v2682_v36 = vld [vmem:[%s2998_s6 + $0x18] sm:$0xff]  }
  0x21   :  { %1937 = vmatpush3.bf16.msra.mxu1 %v2213_v37  ;;  %1944 = vmatprep.subr.bf16.mxu0 %v2215_v41  ;;  %v2688_v37 = vld [vmem:[%s2997_s7 + $0x60] sm:$0xff]   ;;  %v2712_v41 = vld [vmem:[%s2997_s7 + $0x68] sm:$0xff]  }
  0x22   :  { %1966 = vmatprep.subr.bf16.mxu1 %v2216_v42  ;;  %v2718_v42 = vld [vmem:[%s2998_s6 + $0x68] sm:$0xff]  }
  0x23   :  { %649 = vmatmul.mubr.bf16.vlgmr.msra.gmra.mrb[0].mxu0 %v198_v44  ;;  %v2730_v44 = vld [vmem:[%s2998_s6 + $0x28] sm:$0xff]  }
  0x24   :  { %1945 = vmatpush3.bf16.msra.mxu0 %v2217_v46  ;;  %689 = vmatmul.mubr.bf16.vlgmr.msra.gmra.mrb[0].mxu1 %v220_v50  ;;  %v2742_v46 = vld [vmem:[%s2998_s6 + $0x70] sm:$0xff]   ;;  %v2766_v50 = vld [vmem:[%s2998_s6 + $0x78] sm:$0xff]  }
  0x25   :  { %1946 = vmatprep.subr.bf16.mxu0 %v2219_v51  ;;  %1967 = vmatpush3.bf16.msra.mxu1 %v2218_v48  ;;  %v2754_v48 = vld [vmem:[%s2998_s6 + $0x30] sm:$0xff]   ;;  %v2772_v51 = vld [vmem:[%s2997_s7 + $0x38] sm:$0xff]  }
  0x26   :  { %728 = vmatprep.mubr.bf16.mxu0 %v219_v54  ;;  %1968 = vmatprep.subr.bf16.mxu1 %v2220_v53  ;;  %v2780_v53 = vld [vmem:[%s2998_s6 + $0xc0] sm:$0xff]   ;;  %v882_v54 = vcombine.high %v1829_v52, %v1829_v52 }
  0x27   :  { %768 = vmatprep.mubr.bf16.mxu1 %v223_v57  ;;  %v2791_v57 = vld [vmem:[%s2998_s6 + $0x38] sm:$0xff]  }
  0x28   :  { %1947 = vmatpush3.bf16.msra.mxu0 %v2221_v55  ;;  %v1846_v55 = vld.sshfl [vmem:[%s3000_s1] sm:$0x33 pattern:$0x75316420] }
  0x29   :  { %1948 = vmatprep.subr.bf16.mxu0 %v2223_v58  ;;  %1969 = vmatpush3.bf16.msra.mxu1 %v2222_v56  ;;  %v1043_v56 = vcombine.high %v1846_v55, %v1846_v55  ;;  %v896_v58 = vrot.slane %v882_v54, %v2475_v35  ;;  %v2307_v54 = vld [vmem:[%s3004_s11 + $0x20] sm:$0xff]  }
  0x2a   :  { %1970 = vmatprep.subr.bf16.mxu1 %v2224_v59 }
  0x2b   :  { %v1057_v59 = vrot.slane %v1043_v56, %v2475_v35 }
  0x2c   :  { %1949 = vmatpush3.bf16.msra.mxu0 %v2225_v60  ;;  %v889_v60 = vrot.slane %v1829_v52, %v2475_v35 }
  0x2d   :  { %1950 = vmatprep.subr.bf16.mxu0 %v2227_v62  ;;  %1971 = vmatpush3.bf16.msra.mxu1 %v2226_v61  ;;  %v2801_v61 = vld [vmem:[%s2998_s6 + $0x80] sm:$0xff]   ;;  %v2804_v62 = vrot.slane %v1846_v55, %v2475_v35 }
  0x2e   :  { %1972 = vmatprep.subr.bf16.mxu1 %v2228_v63  ;;  %v2810_v63 = vld [vmem:[%s2998_s6 + $0xc8] sm:$0xff]  }
  0x30   :  { %1951 = vmatpush3.bf16.msra.mxu0 %v2229_v0  ;;  %v1059_v0 = vcombine.high %v1057_v59, %v1057_v59 }
  0x31   :  { %1952 = vmatprep.subr.bf16.mxu0 %v2231_v2  ;;  %1973 = vmatpush3.bf16.msra.mxu1 %v2230_v1  ;;  %v2818_v1 = vld [vmem:[%s2998_s6 + $0x88] sm:$0xff]   ;;  %v2825_v2 = vld [vmem:[%s2998_s6 + $0xd0] sm:$0xff]  }
  0x32   :  { %1974 = vmatprep.subr.bf16.mxu1 %v2232_v3  ;;  %v2833_v3 = vld [vmem:[%s2998_s6 + $0x90] sm:$0xff]  }
  0x34   :  { %1953 = vmatpush3.bf16.msra.mxu0 %v2233_v4  ;;  %v2285_v4 = vld [vmem:[%s2998_s6 + $0xd8] sm:$0xff]  }
  0x35   :  { %1954 = vmatprep.subr.bf16.mxu0 %v2235_v6  ;;  %1975 = vmatpush3.bf16.msra.mxu1 %v2234_v5  ;;  %v2286_v5 = vld [vmem:[%s2998_s6 + $0x98] sm:$0xff]   ;;  %v1879_v6 = vld.sshfl [vmem:[%s3001_s4] sm:$0x11 pattern:$0x75316420] }
  0x36   :  { %1976 = vmatprep.subr.bf16.mxu1 %v2236_v7  ;;  %v2287_v7 = vld [vmem:[%s2998_s6 + $0xe0] sm:$0xff]  }
  0x38   :  { %1955 = vmatpush3.bf16.msra.mxu0 %v2237_v8  ;;  %v1346_v8 = vcombine.high %v1879_v6, %v1879_v6 }
  0x39   :  { %1956 = vmatprep.subr.bf16.mxu0 %v2239_v10  ;;  %1977 = vmatpush3.bf16.msra.mxu1 %v2238_v9  ;;  %v2288_v10 = vld [vmem:[%s2998_s6 + $0xa0] sm:$0xff]  }
  0x3a   :  { %1978 = vmatprep.subr.bf16.mxu1 %v2240_v11  ;;  %v1360_v9 = vrot.slane %v1346_v8, %v2475_v35  ;;  %v2289_v11 = vld [vmem:[%s2998_s6 + $0xe8] sm:$0xff]  }
  0x3c   :  { %1957 = vmatpush3.bf16.msra.mxu0 %v2241_v12  ;;  %v2290_v12 = vld [vmem:[%s2998_s6 + $0xa8] sm:$0xff]  }
  0x3d   :  { %1958 = vmatprep.subr.bf16.mxu0 %v2243_v14  ;;  %1979 = vmatpush3.bf16.msra.mxu1 %v2242_v13  ;;  %v2291_v13 = vld [vmem:[%s2998_s6 + $0xf0] sm:$0xff]   ;;  %v1880_v14 = vld.sshfl [vmem:[%s3002_s2] sm:$0x33 pattern:$0x75316420] }
  0x3e   :  { %1980 = vmatprep.subr.bf16.mxu1 %v2244_v15  ;;  %v2292_v15 = vld [vmem:[%s2998_s6 + $0xb0] sm:$0xff]  }
  0x40   :  { %1959 = vmatpush3.bf16.msra.mxu0 %v2245_v16  ;;  %v2293_v16 = vld [vmem:[%s2998_s6 + $0xf8] sm:$0xff]  }
  0x41   :  { %1988 = vmatprep.subr.bf16.mxu0 %v2596_v19  ;;  %1981 = vmatpush3.bf16.msra.mxu1 %v2246_v17  ;;  %v1411_v17 = vcombine.high %v1880_v14, %v1880_v14 }
  0x42   :  { %2010 = vmatprep.subr.bf16.mxu1 %v2601_v20 }
  0x43   :  { %729 = vmatmul.mubr.bf16.vlgmr.msra.gmra.mrb[4].mxu0 %v205_v18  ;;  %v2294_v18 = vld [vmem:[%s2998_s6 + $0xb8] sm:$0xff]  }
  0x44   :  { %1989 = vmatpush3.bf16.msra.mxu0 %v2606_v21  ;;  %769 = vmatmul.mubr.bf16.vlgmr.msra.gmra.mrb[4].mxu1 %v221_v23  ;;  %v1353_v23 = vrot.slane %v1879_v6, %v2475_v35 }
  0x45   :  { %1990 = vmatprep.subr.bf16.mxu0 %v2617_v24  ;;  %2011 = vmatpush3.bf16.msra.mxu1 %v2611_v22 }
  0x46   :  { %2012 = vmatprep.subr.bf16.mxu1 %v2622_v25  ;;  %1027 = vmatprep.mubr.bf16.mxu0 %v896_v58 }
  0x47   :  { %1288 = vmatprep.mubr.bf16.mxu1 %v1057_v59 }
  0x48   :  { %1991 = vmatpush3.bf16.msra.mxu0 %v2628_v26 }
  0x49   :  { %1992 = vmatprep.subr.bf16.mxu0 %v2640_v28  ;;  %2013 = vmatpush3.bf16.msra.mxu1 %v2634_v27 }
  0x4a   :  { %2014 = vmatprep.subr.bf16.mxu1 %v2646_v29 }
  0x4c   :  { %1993 = vmatpush3.bf16.msra.mxu0 %v2652_v30 }
  0x4d   :  { %1994 = vmatprep.subr.bf16.mxu0 %v2664_v32  ;;  %2015 = vmatpush3.bf16.msra.mxu1 %v2658_v31 }
  0x4e   :  { %2016 = vmatprep.subr.bf16.mxu1 %v2670_v33 }
  0x50   :  { %1995 = vmatpush3.bf16.msra.mxu0 %v2676_v34 }
  0x51   :  { %1996 = vmatprep.subr.bf16.mxu0 %v2688_v37  ;;  %2017 = vmatpush3.bf16.msra.mxu1 %v2682_v36 }
  0x52   :  { %2018 = vmatprep.subr.bf16.mxu1 %v2694_v38 }
  0x54   :  { %1997 = vmatpush3.bf16.msra.mxu0 %v2700_v39 }
  0x55   :  { %1998 = vmatprep.subr.bf16.mxu0 %v2712_v41  ;;  %2019 = vmatpush3.bf16.msra.mxu1 %v2706_v40 }
  0x56   :  { %2020 = vmatprep.subr.bf16.mxu1 %v2718_v42 }
  0x58   :  { %1999 = vmatpush3.bf16.msra.mxu0 %v2724_v43 }
  0x59   :  { %2000 = vmatprep.subr.bf16.mxu0 %v2736_v45  ;;  %2021 = vmatpush3.bf16.msra.mxu1 %v2730_v44 }
  0x5a   :  { %2022 = vmatprep.subr.bf16.mxu1 %v2742_v46 }
  0x5c   :  { %2001 = vmatpush3.bf16.msra.mxu0 %v2748_v47 }
  0x5d   :  { %2002 = vmatprep.subr.bf16.mxu0 %v2760_v49  ;;  %2023 = vmatpush3.bf16.msra.mxu1 %v2754_v48 }
  0x5e   :  { %2024 = vmatprep.subr.bf16.mxu1 %v2766_v50 }
  0x60   :  { %2003 = vmatpush3.bf16.msra.mxu0 %v2772_v51 }
  0x61   :  { %2032 = vmatprep.subr.bf16.mxu0 %v2780_v53  ;;  %2025 = vmatpush3.bf16.msra.mxu1 %v2791_v57 }
  0x62   :  { %2054 = vmatprep.subr.bf16.mxu1 %v2596_v19  ;;  %v1425_v19 = vrot.slane %v1411_v17, %v2475_v35 }
  0x63   :  { %1028 = vmatmul.mubr.bf16.vlgmr.msra.gmra.mrb[8].mxu0 %v889_v60 }
  0x64   :  { %2033 = vmatpush3.bf16.msra.mxu0 %v2801_v61  ;;  %1328 = vmatprep.mubr.bf16.mxu0 %v1059_v0 }
  0x65   :  { %1289 = vmatmul.mubr.bf16.vlgmr.msra.gmra.mrb[8].mxu1 %v2804_v62  ;;  %2034 = vmatprep.subr.bf16.mxu0 %v2810_v63 }
  0x66   :  { %2055 = vmatpush3.bf16.msra.mxu1 %v2606_v21  ;;  %1395 = vmatprep.mubr.bf16.mxu1 %v1360_v9  ;;  %v1058_v21 = vcombine.high %v2804_v62, %v2804_v62  ;;  %v2308_v62 = vld [vmem:[%s3004_s11 + $0x28] sm:$0xff]  }
  0x67   :  { %2056 = vmatprep.subr.bf16.mxu1 %v2617_v24  ;;  %v1427_v24 = vcombine.high %v1425_v19, %v1425_v19 }
  0x68   :  { %2035 = vmatpush3.bf16.msra.mxu0 %v2818_v1 }
  0x69   :  { %2036 = vmatprep.subr.bf16.mxu0 %v2825_v2 }
  0x6a   :  { %2057 = vmatpush3.bf16.msra.mxu1 %v2628_v26  ;;  %v2295_v26 = vld [vmem:[%s3003_s9] sm:$0xff]  }
  0x6b   :  { %2058 = vmatprep.subr.bf16.mxu1 %v2640_v28 }
  0x6c   :  { %2037 = vmatpush3.bf16.msra.mxu0 %v2833_v3 }
  0x6d   :  { %2038 = vmatprep.subr.bf16.mxu0 %v2285_v4 }
  0x6e   :  { %2059 = vmatpush3.bf16.msra.mxu1 %v2652_v30 }
  0x6f   :  { %2060 = vmatprep.subr.bf16.mxu1 %v2664_v32 }
  0x70   :  { %2039 = vmatpush3.bf16.msra.mxu0 %v2286_v5 }
  0x71   :  { %2040 = vmatprep.subr.bf16.mxu0 %v2287_v7 }
  0x72   :  { %2061 = vmatpush3.bf16.msra.mxu1 %v2676_v34 }
  0x73   :  { %2062 = vmatprep.subr.bf16.mxu1 %v2688_v37 }
  0x74   :  { %2041 = vmatpush3.bf16.msra.mxu0 %v2288_v10 }
  0x75   :  { %2042 = vmatprep.subr.bf16.mxu0 %v2289_v11 }
  0x76   :  { %2063 = vmatpush3.bf16.msra.mxu1 %v2700_v39  ;;  %v2299_v39 = vld [vmem:[%s3003_s9 + $0x20] sm:$0xff]  }
  0x77   :  { %2064 = vmatprep.subr.bf16.mxu1 %v2712_v41 }
  0x78   :  { %2043 = vmatpush3.bf16.msra.mxu0 %v2290_v12 }
  0x79   :  { %2044 = vmatprep.subr.bf16.mxu0 %v2291_v13 }
  0x7a   :  { %2065 = vmatpush3.bf16.msra.mxu1 %v2724_v43  ;;  %v2301_v43 = vld [vmem:[%s3003_s9 + $0x30] sm:$0xff]  }
  0x7b   :  { %2066 = vmatprep.subr.bf16.mxu1 %v2736_v45  ;;  %v2303_v45 = vld [vmem:[%s3004_s11] sm:$0xff]  }
  0x7c   :  { %2045 = vmatpush3.bf16.msra.mxu0 %v2292_v15 }
  0x7d   :  { %2046 = vmatprep.subr.bf16.mxu0 %v2293_v16 }
  0x7e   :  { %2067 = vmatpush3.bf16.msra.mxu1 %v2748_v47  ;;  %v2305_v47 = vld [vmem:[%s3004_s11 + $0x10] sm:$0xff]  }
  0x7f   :  { %2068 = vmatprep.subr.bf16.mxu1 %v2760_v49 }
  0x80   :  { %2047 = vmatpush3.bf16.msra.mxu0 %v2294_v18 }
  0x81   :  { %2076 = vmatprep.subr.bf16.mxu0 %v2601_v20  ;;  %v1418_v20 = vrot.slane %v1880_v14, %v2475_v35  ;;  %v2296_v35 = vld [vmem:[%s3003_s9 + $0x8] sm:$0xff]  }
  0x82   :  { %2069 = vmatpush3.bf16.msra.mxu1 %v2772_v51 }
  0x83   :  { %1329 = vmatmul.mubr.bf16.vlgmr.msra.gmra.mrb[12].mxu0 %v1058_v21  ;;  %2098 = vmatprep.subr.bf16.mxu1 %v2780_v53 }
  0x84   :  { %2077 = vmatpush3.bf16.msra.mxu0 %v2611_v22  ;;  %1464 = vmatprep.mubr.bf16.mxu0 %v1425_v19  ;;  %v1426_v22 = vcombine.high %v1418_v20, %v1418_v20 }
  0x85   :  { %1396 = vmatmul.mubr.bf16.vlgmr.msra.gmra.mrb[12].mxu1 %v1353_v23  ;;  %2078 = vmatprep.subr.bf16.mxu0 %v2622_v25  ;;  %v2312_v25 = vmov 0.0  }
  0x86   :  { %2099 = vmatpush3.bf16.msra.mxu1 %v2801_v61  ;;  %1504 = vmatprep.mubr.bf16.mxu1 %v1427_v24 }
  0x87   :  { %2100 = vmatprep.subr.bf16.mxu1 %v2810_v63 }
  0x88   :  { %2079 = vmatpush3.bf16.msra.mxu0 %v2634_v27  ;;  %v2297_v27 = vld [vmem:[%s3003_s9 + $0x10] sm:$0xff]  }
  0x89   :  { %2080 = vmatprep.subr.bf16.mxu0 %v2646_v29  ;;  %v2298_v29 = vld [vmem:[%s3003_s9 + $0x18] sm:$0xff]  }
  0x8a   :  { %2101 = vmatpush3.bf16.msra.mxu1 %v2818_v1 }
  0x8b   :  { %2102 = vmatprep.subr.bf16.mxu1 %v2825_v2 }
  0x8c   :  { %2081 = vmatpush3.bf16.msra.mxu0 %v2658_v31 }
  0x8d   :  { %2082 = vmatprep.subr.bf16.mxu0 %v2670_v33 }
  0x8e   :  { %2103 = vmatpush3.bf16.msra.mxu1 %v2833_v3 }
  0x8f   :  { %2104 = vmatprep.subr.bf16.mxu1 %v2285_v4 }
  0x90   :  { %2083 = vmatpush3.bf16.msra.mxu0 %v2682_v36 }
  0x91   :  { %2084 = vmatprep.subr.bf16.mxu0 %v2694_v38 }
  0x92   :  { %2105 = vmatpush3.bf16.msra.mxu1 %v2286_v5 }
  0x93   :  { %2106 = vmatprep.subr.bf16.mxu1 %v2287_v7 }
  0x94   :  { %2085 = vmatpush3.bf16.msra.mxu0 %v2706_v40 }
  0x95   :  { %2086 = vmatprep.subr.bf16.mxu0 %v2718_v42  ;;  %v2300_v42 = vld [vmem:[%s3003_s9 + $0x28] sm:$0xff]  }
  0x96   :  { %2107 = vmatpush3.bf16.msra.mxu1 %v2288_v10 }
  0x97   :  { %2108 = vmatprep.subr.bf16.mxu1 %v2289_v11 }
  0x98   :  { %2087 = vmatpush3.bf16.msra.mxu0 %v2730_v44  ;;  %v2302_v44 = vld [vmem:[%s3003_s9 + $0x38] sm:$0xff]  }
  0x99   :  { %2088 = vmatprep.subr.bf16.mxu0 %v2742_v46  ;;  %v2304_v46 = vld [vmem:[%s3004_s11 + $0x8] sm:$0xff]  }
  0x9a   :  { %2109 = vmatpush3.bf16.msra.mxu1 %v2290_v12 }
  0x9b   :  { %2110 = vmatprep.subr.bf16.mxu1 %v2291_v13 }
  0x9c   :  { %2089 = vmatpush3.bf16.msra.mxu0 %v2754_v48  ;;  %v2306_v48 = vld [vmem:[%s3004_s11 + $0x18] sm:$0xff]  }
  0x9d   :  { %2090 = vmatprep.subr.bf16.mxu0 %v2766_v50 }
  0x9e   :  { %2111 = vmatpush3.bf16.msra.mxu1 %v2292_v15 }
  0x9f   :  { %2112 = vmatprep.subr.bf16.mxu1 %v2293_v16 }
  0xa0   :  { %2091 = vmatpush3.bf16.msra.mxu0 %v2791_v57 }
  0xa1   :  { %2138 = vmatprep.subr.bf16.mxu0 %v2312_v25 }
  0xa2   :  { %2113 = vmatpush3.bf16.msra.mxu1 %v2294_v18 }
  0xa3   :  { %1465 = vmatmul.mubr.bf16.vlgmr.msra.gmra.mrb[16].mxu0 %v1418_v20  ;;  %2158 = vmatprep.subr.bf16.mxu1 %v2312_v25 }
  0xa4   :  { %2139 = vmatpush3.bf16.msra.mxu0 %v2295_v26  ;;  %2154 = vmatprep.mubr.msk.bf16.mxu0 %vm2313_vm0, %v2312_v25 }
  0xa5   :  { %1505 = vmatmul.mubr.bf16.vlgmr.msra.gmra.mrb[16].mxu1 %v1426_v22  ;;  %2140 = vmatprep.subr.bf16.mxu0 %v2312_v25 }
  0xa6   :  { %2174 = vmatprep.mubr.msk.bf16.mxu1 %vm2313_vm0, %v2312_v25  ;;  %2159 = vmatpush3.bf16.msra.mxu1 %v2303_v45 }
  0xa7   :  { %2160 = vmatprep.subr.bf16.mxu1 %v2312_v25 }
  0xa8   :  { %2141 = vmatpush3.bf16.msra.mxu0 %v2296_v35 }
  0xa9   :  { %2142 = vmatprep.subr.bf16.mxu0 %v2312_v25 }
  0xaa   :  { %2161 = vmatpush3.bf16.msra.mxu1 %v2304_v46 }
  0xab   :  { %2162 = vmatprep.subr.bf16.mxu1 %v2312_v25 }
  0xac   :  { %2143 = vmatpush3.bf16.msra.mxu0 %v2297_v27 }
  0xad   :  { %2144 = vmatprep.subr.bf16.mxu0 %v2312_v25 }
  0xae   :  { %2163 = vmatpush3.bf16.msra.mxu1 %v2305_v47 }
  0xaf   :  { %2164 = vmatprep.subr.bf16.mxu1 %v2312_v25 }
  0xb0   :  { %2145 = vmatpush3.bf16.msra.mxu0 %v2298_v29 }
  0xb1   :  { %2146 = vmatprep.subr.bf16.mxu0 %v2312_v25 }
  0xb2   :  { %2165 = vmatpush3.bf16.msra.mxu1 %v2306_v48 }
  0xb3   :  { %2166 = vmatprep.subr.bf16.mxu1 %v2312_v25 }
  0xb4   :  { %2147 = vmatpush3.bf16.msra.mxu0 %v2299_v39 }
  0xb5   :  { %2148 = vmatprep.subr.bf16.mxu0 %v2312_v25 }
  0xb6   :  { %2167 = vmatpush3.bf16.msra.mxu1 %v2307_v54 }
  0xb7   :  { %2168 = vmatprep.subr.bf16.mxu1 %v2312_v25 }
  0xb8   :  { %2149 = vmatpush3.bf16.msra.mxu0 %v2300_v42  ;;  %v2309_v42 = vld [vmem:[%s3004_s11 + $0x30] sm:$0xff]  }
  0xb9   :  { %2150 = vmatprep.subr.bf16.mxu0 %v2312_v25 }
  0xba   :  { %2169 = vmatpush3.bf16.msra.mxu1 %v2308_v62 }
  0xbb   :  { %2170 = vmatprep.subr.bf16.mxu1 %v2312_v25 }
  0xbc   :  { %2151 = vmatpush3.bf16.msra.mxu0 %v2301_v43  ;;  %v2310_v43 = vld [vmem:[%s3004_s11 + $0x38] sm:$0xff]  }
  0xbd   :  { %2152 = vmatprep.subr.bf16.mxu0 %v2312_v25 }
  0xbe   :  { %2171 = vmatpush3.bf16.msra.mxu1 %v2309_v42 }
  0xbf   :  { %2172 = vmatprep.subr.bf16.mxu1 %v2312_v25  ;;  %v1891_v25 = vld [vmem:[%s3007_s12] ss:$0 sm:$0xff] }
  0xc0   :  { %2153 = vmatpush3.bf16.msra.mxu0 %v2302_v44  ;;  %v1882_v44 = vld [vmem:[%s3006_s10] ss:$0 sm:$0xff]  ;;  %s2314_s10 = smov 2  }
  0xc2   :  { %2173 = vmatpush3.bf16.msra.mxu1 %v2310_v43 }
  0xf6   :  { %v1916_v28 = vpop.f32.mrb[0].mxu0 }
  0xf7   :  { %v1917_v30 = vpop.f32.mrb[1].mxu0  ;;  %v1938_v31 = vpop.f32.mrb[0].mxu1 }
  0xf8   :  { %v1918_v32 = vadd.f32 %v1917_v30, %v1916_v28  ;;  %v1919_v33 = vpop.f32.mrb[2].mxu0  ;;  %v1939_v34 = vpop.f32.mrb[1].mxu1 }
  0xf9   :  { %v1920_v36 = vpop.f32.mrb[3].mxu0  ;;  %v1940_v37 = vadd.f32 %v1939_v34, %v1938_v31  ;;  %v1941_v38 = vpop.f32.mrb[2].mxu1 }
  0xfa   :  { %v1942_v40 = vpop.f32.mrb[3].mxu1 }
  0xfb   :  { %v691_v41 = vadd.f32 %v1940_v37, %v1918_v32  ;;  %v1881_v37 = vld [vmem:[%s3005_s8] ss:$0 sm:$0xff] }
 0x116   :  { %v1960_v49 = vpop.f32.mrb[4].mxu0 }
 0x117   :  { %v1961_v50 = vpop.f32.mrb[5].mxu0  ;;  %v1982_v51 = vpop.f32.mrb[4].mxu1 }
 0x118   :  { %v1962_v52 = vadd.f32 %v1961_v50, %v1960_v49  ;;  %v1963_v53 = vpop.f32.mrb[6].mxu0  ;;  %v1983_v55 = vpop.f32.mrb[5].mxu1 }
 0x119   :  { %v1964_v56 = vpop.f32.mrb[7].mxu0  ;;  %v1984_v58 = vadd.f32 %v1983_v55, %v1982_v51  ;;  %v1985_v59 = vpop.f32.mrb[6].mxu1 }
 0x11a   :  { %v731_v57 = vadd.f32 %v1962_v52, %v691_v41  ;;  %v1986_v60 = vpop.f32.mrb[7].mxu1 }
 0x11c   :  { %v771_v61 = vadd.f32 %v1984_v58, %v731_v57 }
 0x136   :  { %v2004_v63 = vpop.f32.mrb[8].mxu0 }
 0x137   :  { %v2005_v0 = vpop.f32.mrb[9].mxu0 }
 0x138   :  { %v2026_v1 = vpop.f32.mrb[8].mxu1  ;;  %v2006_v2 = vadd.f32 %v2005_v0, %v2004_v63  ;;  %v2007_v3 = vpop.f32.mrb[10].mxu0 }
 0x139   :  { %v2027_v4 = vpop.f32.mrb[9].mxu1  ;;  %v2008_v5 = vpop.f32.mrb[11].mxu0 }
 0x13a   :  { %v2028_v6 = vadd.f32 %v2027_v4, %v2026_v1  ;;  %v2029_v7 = vpop.f32.mrb[10].mxu1 }
 0x13b   :  { %v2030_v8 = vpop.f32.mrb[11].mxu1 }
 0x13c   :  { %v1291_v9 = vadd.f32 %v2028_v6, %v2006_v2 }
 0x156   :  { %v2048_v10 = vpop.f32.mrb[12].mxu0 }
 0x157   :  { %v2049_v11 = vpop.f32.mrb[13].mxu0 }
 0x158   :  { %v2070_v12 = vpop.f32.mrb[12].mxu1  ;;  %v2050_v13 = vadd.f32 %v2049_v11, %v2048_v10  ;;  %v2051_v14 = vpop.f32.mrb[14].mxu0 }
 0x159   :  { %v2071_v15 = vpop.f32.mrb[13].mxu1  ;;  %v2052_v16 = vpop.f32.mrb[15].mxu0 }
 0x15a   :  { %v1331_v17 = vadd.f32 %v2050_v13, %v1291_v9  ;;  %v2072_v18 = vadd.f32 %v2071_v15, %v2070_v12  ;;  %v2073_v19 = vpop.f32.mrb[14].mxu1 }
 0x15b   :  { %v2074_v21 = vpop.f32.mrb[15].mxu1 }
 0x15c   :  { %v1512_v23 = vadd.f32 %v1331_v17, %v771_v61 }
 0x176   :  { %v2092_v24 = vpop.f32.mrb[16].mxu0 }
 0x177   :  { %v2093_v20 = vpop.f32.mrb[17].mxu0 }
 0x178   :  { %v2114_v22 = vpop.f32.mrb[16].mxu1  ;;  %v2094_v26 = vadd.f32 %v2093_v20, %v2092_v24  ;;  %v2095_v35 = vpop.f32.mrb[18].mxu0 }
 0x179   :  { %v2115_v27 = vpop.f32.mrb[17].mxu1  ;;  %v2096_v28 = vpop.f32.mrb[19].mxu0 }
 0x17a   :  { %v1467_v29 = vadd.f32 %v2094_v26, %v2072_v18  ;;  %v2116_v30 = vadd.f32 %v2115_v27, %v2114_v22  ;;  %v2117_v31 = vpop.f32.mrb[18].mxu1 }
 0x17b   :  { %v2118_v32 = vpop.f32.mrb[19].mxu1 }
 0x17c   :  { %v1507_v33 = vadd.f32 %v2116_v30, %v1467_v29 }
 0x17e   :  { %v1513_v34 = vadd.f32 %v1507_v33, %v771_v61 }
 0x180   :  { %v1515_v36 = vrot.slane %v1513_v34, 6 }
 0x182   :  { %v1518_v38 = vsel %vm1517_vm1, %v1512_v23, %v1515_v36 }
 0x183   :  { %v1526_v39 = vadd.f32 %v1881_v37, %v1518_v38 }
 0x185   :  { %v1527_v40 = vmax.f32 %v1526_v39, 0.0 }
 0x187   :  { %v1528_v41 = vpack.c.bf16 %v1527_v40, %v1527_v40 }
 0x189   :  { %2155 = vmatmul.mubr.bf16.vlgmr.msra.gmra.mrb[20].mxu0 %v1528_v41 }
 0x25c   :  { %v1634_v45 = vpop.f32.mrb[20].mxu0 }
 0x25d   :  { %v1635_v46 = vadd.f32 %v1882_v44, %v1634_v45  ;;  %v2156_v47 = vpop.f32.mrb[21].mxu0 }
 0x25e   :  { %v1637_v48 = vpop.f32.mrb[22].mxu0 }
 0x25f   :  { %v1640_v49 = vmax.f32 %v1635_v46, 0.0  ;;  %v2157_v50 = vpop.f32.mrb[23].mxu0 }
 0x261   :  { %v1641_v51 = vpack.c.bf16 %v1640_v49, %v1640_v49 }
 0x263   :  { %2175 = vmatmul.mubr.bf16.vlgmr.msra.gmra.mrb[20].mxu1 %v1641_v51 }
 0x336   :  { %v1747_v52 = vpop.f32.mrb[20].mxu1 }
 0x337   :  { %v1748_v53 = vadd.f32 %v1891_v25, %v1747_v52  ;;  %v2176_v54 = vpop.f32.mrb[21].mxu1 }
 0x338   :  { %v1750_v55 = vpop.f32.mrb[22].mxu1 }
 0x339   :  { %1754 = vst.msk [vmem:[%s3008_s13] sm:$0x3] %vm1753_vm2, %v1748_v53  ;;  %v2177_v56 = vpop.f32.mrb[23].mxu1  ;;  %1756 = vrot.lane.b32.xlu0 %v1748_v53, %s2314_s10 }
 0x3ab   :  { %v1757_v57 = vpop.permute.xlu0 %1756 }
 0x3ac   :  { %1760 = vst.msk [vmem:[%s3008_s13 - $0x2] sm:$0xc] %vm1759_vm3, %v1757_v57 }

</bundles_post_ra>
